<compile_context>
chip_gen: v7x
topology: tpu7x:2x2x1
jax: 0.10.0
libtpu: 0.0.40
codegen_flags: <defaults>
</compile_context>

<pallas_src>
import jax
import jax.numpy as jnp
from jax import lax
from jax.experimental import pallas as pl
from jax.experimental.pallas import tpu as pltpu


def _round_up(x, m):
    return (x + m - 1) // m * m


def _pick_row_tile(h, w, cout_pad, bytes_budget=1 << 20):
    """Largest row tile dividing h whose f32 output tile fits the budget; keep >=2 tiles
    when possible so the second 'parallel' grid axis can feed both v7x TensorCores."""
    best = 1
    for t in (64, 32, 16, 8, 4, 2, 1):
        if h % t == 0 and t * w * cout_pad * 4 <= bytes_budget:
            best = t
            break
    while best > 1 and h // best < 2:
        best //= 2
        if best == 0 or h % best != 0:
            best = 1
    return best


def conv_bn_relu_kernel(x_ref, w_ref, bias_ref, o_ref, col_ref):
    # x_ref:    (1, H+2, W+2, Cin_p)  spatially padded + channel-padded input (bf16),
    #                                 resident across the row-tile grid axis.
    # w_ref:    (9*Cin_p, Cout_p)     BN-scale-folded conv weights (bf16).
    # bias_ref: (1, Cout_p)           folded BN bias (f32).
    # o_ref:    (1, TH, W, Cout_p)    output row tile.
    # col_ref:  (TH, W, 9*Cin_p)      im2col VMEM scratch (bf16).
    TH, W, Cout_p = o_ref.shape[1], o_ref.shape[2], o_ref.shape[3]
    Cin_p = x_ref.shape[3]
    K = 9 * Cin_p

    r = pl.program_id(1)
    row0 = pl.multiple_of(r * TH, TH)

    # im2col: 9 cheap VMEM copies -> a single K = 9*Cin_p matmul on the MXU
    # (instead of 9 tiny slice+reshape matmuls).
    for kh in range(3):
        for kw in range(3):
            k = kh * 3 + kw
            col_ref[:, :, k * Cin_p:(k + 1) * Cin_p] = \
                x_ref[0, pl.ds(row0 + kh, TH), pl.ds(kw, W), :]

    acc = jnp.dot(col_ref[...].reshape(TH * W, K), w_ref[...],
                  preferred_element_type=jnp.float32)        # (TH*W, Cout_p) f32
    y = jnp.maximum(acc + bias_ref[...], 0.0)                # f32 bias + ReLU epilogue
    o_ref[0] = y.reshape(TH, W, Cout_p).astype(o_ref.dtype)


def conv_bn_relu(x_nchw, w_oihw, gamma, beta, running_mean, running_var, eps=1e-5):
    N, Cin, H, W = x_nchw.shape
    Cout = w_oihw.shape[0]

    cin_p = max(16, _round_up(Cin, 16))    # im2col K = 9*cin_p >= 144 keeps the MXU K dim busy
    cout_p = _round_up(Cout, 128)          # lane-dense output stores / matmul N dim
    TH = _pick_row_tile(H, W, cout_p)
    R = H // TH

    # ---- wrapper glue (plain JAX) -------------------------------------------------------
    # TODO(synk): if the surrounding model can run NHWC end-to-end, drop these transposes.
    x = jnp.transpose(x_nchw, (0, 2, 3, 1))                                   # NHWC
    # TODO(synk): the 1-px halo could be generated in-kernel (haloed row-tile DMA) to save
    # this HBM pass; kept because the channel pad needs a pass anyway at tiny Cin.
    x_pad = jnp.pad(x, ((0, 0), (1, 1), (1, 1), (0, cin_p - Cin))).astype(jnp.bfloat16)

    inv_std = lax.rsqrt(running_var.astype(jnp.float32) + eps)
    scale = gamma.astype(jnp.float32) * inv_std                               # (Cout,)
    bias = beta.astype(jnp.float32) - running_mean.astype(jnp.float32) * scale

    # Fold BN scale into the conv weights -> kernel epilogue is only bias + ReLU.
    w_f = w_oihw.astype(jnp.float32) * scale[:, None, None, None]             # OIHW
    w_hwio = jnp.transpose(w_f, (2, 3, 1, 0))                                 # (3,3,Cin,Cout)
    w_hwio = jnp.pad(w_hwio, ((0, 0), (0, 0), (0, cin_p - Cin), (0, cout_p - Cout)))
    w2d = w_hwio.reshape(9 * cin_p, cout_p).astype(jnp.bfloat16)              # (9*Cin_p, Cout_p)

    bias_p = jnp.pad(bias, (0, cout_p - Cout)).reshape(1, cout_p)

    out_dtype = x_nchw.dtype
    flops = 2 * N * H * W * Cout * 9 * Cin
    bytes_accessed = (x_pad.size * x_pad.dtype.itemsize
                      + w2d.size * w2d.dtype.itemsize
                      + bias_p.size * 4
                      + N * H * W * cout_p * jnp.dtype(out_dtype).itemsize)

    out_nhwc = pl.pallas_call(
        conv_bn_relu_kernel,
        out_shape=jax.ShapeDtypeStruct((N, H, W, cout_p), out_dtype),
        grid_spec=pltpu.PrefetchScalarGridSpec(
            num_scalar_prefetch=0,
            grid=(N, R),
            in_specs=[
                # whole padded image stays resident across the row-tile axis (tiny at these
                # channel counts); weights/bias are grid-invariant.
                pl.BlockSpec((1, H + 2, W + 2, cin_p), lambda n, r: (n, 0, 0, 0)),
                pl.BlockSpec((9 * cin_p, cout_p), lambda n, r: (0, 0)),
                pl.BlockSpec((1, cout_p), lambda n, r: (0, 0)),
            ],
            out_specs=pl.BlockSpec((1, TH, W, cout_p), lambda n, r: (n, r, 0, 0)),
            scratch_shapes=[pltpu.VMEM((TH, W, 9 * cin_p), jnp.bfloat16)],
        ),
        compiler_params=pltpu.CompilerParams(
            dimension_semantics=("parallel", "parallel"),
            vmem_limit_bytes=32 * 1024 * 1024,
        ),
        cost_estimate=pl.CostEstimate(flops=flops, transcendentals=0,
                                      bytes_accessed=bytes_accessed),
    )(x_pad, w2d, bias_p)

    out = out_nhwc[..., :Cout]                      # drop channel padding
    return jnp.transpose(out, (0, 3, 1, 2))         # back to NCHW


def reference_conv_bn_relu(x_nchw, w_oihw, gamma, beta, running_mean, running_var, eps=1e-5):
    y = lax.conv_general_dilated(
        x_nchw, w_oihw, window_strides=(1, 1), padding=((1, 1), (1, 1)),
        dimension_numbers=("NCHW", "OIHW", "NCHW"))
    inv_std = 1.0 / jnp.sqrt(running_var + eps)
    scale = (gamma * inv_std).reshape(1, -1, 1, 1)
    bias = (beta - running_mean * gamma * inv_std).reshape(1, -1, 1, 1)
    return jnp.maximum(y * scale + bias, 0.0)


if __name__ == "__main__":
    key = jax.random.PRNGKey(0)
    k_x, k_w = jax.random.split(key)

    N, Cin, H, W = 2, 4, 16, 16
    Cout, KS = 8, 3

    x = jax.random.normal(k_x, (N, Cin, H, W), dtype=jnp.float32)

    # Conv weight: kaiming_normal_(a=1) -> std = sqrt(2/(1+1)) / sqrt(fan_in) = 1/sqrt(Cin*ks*ks)
    fan_in = Cin * KS * KS
    std = 1.0 / jnp.sqrt(jnp.float32(fan_in))
    w = jax.random.normal(k_w, (Cout, Cin, KS, KS), dtype=jnp.float32) * std

    # BatchNorm2d default parameters / running stats (inference semantics).
    gamma = jnp.ones((Cout,), jnp.float32)
    beta = jnp.zeros((Cout,), jnp.float32)
    running_mean = jnp.zeros((Cout,), jnp.float32)
    running_var = jnp.ones((Cout,), jnp.float32)
    # TODO(synk): training-mode BN (batch statistics + running-stat update) not implemented;
    # eval-mode (running-stat) BN is used, matching inference semantics.

    out = conv_bn_relu(x, w, gamma, beta, running_mean, running_var)
    out = jax.block_until_ready(out)

    ref = reference_conv_bn_relu(x, w, gamma, beta, running_mean, running_var)
    assert out.shape == (N, Cout, H, W)
    # bf16 matmul operands (f32 accumulation) => loosened tolerance vs the all-f32 reference.
    err = float(jnp.max(jnp.abs(out - ref)))
    assert jnp.allclose(out, ref, atol=5e-2, rtol=5e-2), f"max abs err {err}"

    print("KERNEL_OK")
</pallas_src>

<mosaic_0001>
module attributes {stable_mosaic.version = 11 : i64} {
  func.func @conv_bn_relu_kernel(%arg0: i32, %arg1: i32, %arg2: memref<1x18x18x16xbf16, #tpu.memory_space<vmem>>, %arg3: memref<144x128xbf16, #tpu.memory_space<vmem>>, %arg4: memref<1x128xf32, #tpu.memory_space<vmem>>, %arg5: memref<1x8x16x128xf32, #tpu.memory_space<vmem>>, %arg6: memref<8x16x144xbf16, #tpu.memory_space<vmem>>) attributes {dimension_semantics = [#tpu.dimension_semantics<parallel>, #tpu.dimension_semantics<parallel>], iteration_bounds = array<i64: 2, 2>, scalar_prefetch = 0 : i64, scratch_operands = 1 : i64, tpu.core_type = #tpu.core_type<tc>, window_params = [{transform_indices = @transform_0, window_bounds = array<i64: 1, 18, 18, 16>}, {pipeline_mode = #tpu.pipeline_mode<synchronous>, transform_indices = @transform_1, window_bounds = array<i64: 144, 128>}, {pipeline_mode = #tpu.pipeline_mode<synchronous>, transform_indices = @transform_2, window_bounds = array<i64: 1, 128>}, {transform_indices = @transform_3, window_bounds = array<i64: 1, 8, 16, 128>}]} {
    %c8_i32 = arith.constant 8 : i32
    %0 = arith.muli %arg1, %c8_i32 : i32
    %1 = tpu.assume_multiple %0, 8 : i32
    %c0_i32 = arith.constant 0 : i32
    %2 = arith.addi %1, %c0_i32 : i32
    %c0 = arith.constant 0 : index
    %3 = arith.index_cast %2 : i32 to index
    %c0_0 = arith.constant 0 : index
    %c0_1 = arith.constant 0 : index
    %4 = vector.load %arg2[%c0, %3, %c0_0, %c0_1] : memref<1x18x18x16xbf16, #tpu.memory_space<vmem>>, vector<1x8x16x16xbf16>
    %5 = vector.shape_cast %4 : vector<1x8x16x16xbf16> to vector<8x16x16xbf16>
    %c0_2 = arith.constant 0 : index
    %c0_3 = arith.constant 0 : index
    %c0_4 = arith.constant 0 : index
    %6 = vector.load %arg6[%c0_2, %c0_3, %c0_4] : memref<8x16x144xbf16, #tpu.memory_space<vmem>>, vector<8x16x16xbf16>
    tpu.vector_store %arg6[%c0_2, %c0_3, %c0_4], %5 {strides = array<i32>} : memref<8x16x144xbf16, #tpu.memory_space<vmem>>, vector<8x16x16xbf16>,
    %c0_i32_5 = arith.constant 0 : i32
    %7 = arith.addi %1, %c0_i32_5 : i32
    %c0_6 = arith.constant 0 : index
    %8 = arith.index_cast %7 : i32 to index
    %c1 = arith.constant 1 : index
    %c0_7 = arith.constant 0 : index
    %9 = vector.load %arg2[%c0_6, %8, %c1, %c0_7] : memref<1x18x18x16xbf16, #tpu.memory_space<vmem>>, vector<1x8x16x16xbf16>
    %10 = vector.shape_cast %9 : vector<1x8x16x16xbf16> to vector<8x16x16xbf16>
    %c0_8 = arith.constant 0 : index
    %c0_9 = arith.constant 0 : index
    %c16 = arith.constant 16 : index
    %11 = vector.load %arg6[%c0_8, %c0_9, %c16] : memref<8x16x144xbf16, #tpu.memory_space<vmem>>, vector<8x16x16xbf16>
    tpu.vector_store %arg6[%c0_8, %c0_9, %c16], %10 {strides = array<i32>} : memref<8x16x144xbf16, #tpu.memory_space<vmem>>, vector<8x16x16xbf16>,
    %c0_i32_10 = arith.constant 0 : i32
    %12 = arith.addi %1, %c0_i32_10 : i32
    %c0_11 = arith.constant 0 : index
    %13 = arith.index_cast %12 : i32 to index
    %c2 = arith.constant 2 : index
    %c0_12 = arith.constant 0 : index
    %14 = vector.load %arg2[%c0_11, %13, %c2, %c0_12] : memref<1x18x18x16xbf16, #tpu.memory_space<vmem>>, vector<1x8x16x16xbf16>
    %15 = vector.shape_cast %14 : vector<1x8x16x16xbf16> to vector<8x16x16xbf16>
    %c0_13 = arith.constant 0 : index
    %c0_14 = arith.constant 0 : index
    %c32 = arith.constant 32 : index
    %16 = vector.load %arg6[%c0_13, %c0_14, %c32] : memref<8x16x144xbf16, #tpu.memory_space<vmem>>, vector<8x16x16xbf16>
    tpu.vector_store %arg6[%c0_13, %c0_14, %c32], %15 {strides = array<i32>} : memref<8x16x144xbf16, #tpu.memory_space<vmem>>, vector<8x16x16xbf16>,
    %c1_i32 = arith.constant 1 : i32
    %17 = arith.addi %1, %c1_i32 : i32
    %c0_15 = arith.constant 0 : index
    %18 = arith.index_cast %17 : i32 to index
    %c0_16 = arith.constant 0 : index
    %c0_17 = arith.constant 0 : index
    %19 = vector.load %arg2[%c0_15, %18, %c0_16, %c0_17] : memref<1x18x18x16xbf16, #tpu.memory_space<vmem>>, vector<1x8x16x16xbf16>
    %20 = vector.shape_cast %19 : vector<1x8x16x16xbf16> to vector<8x16x16xbf16>
    %c0_18 = arith.constant 0 : index
    %c0_19 = arith.constant 0 : index
    %c48 = arith.constant 48 : index
    %21 = vector.load %arg6[%c0_18, %c0_19, %c48] : memref<8x16x144xbf16, #tpu.memory_space<vmem>>, vector<8x16x16xbf16>
    tpu.vector_store %arg6[%c0_18, %c0_19, %c48], %20 {strides = array<i32>} : memref<8x16x144xbf16, #tpu.memory_space<vmem>>, vector<8x16x16xbf16>,
    %c1_i32_20 = arith.constant 1 : i32
    %22 = arith.addi %1, %c1_i32_20 : i32
    %c0_21 = arith.constant 0 : index
    %23 = arith.index_cast %22 : i32 to index
    %c1_22 = arith.constant 1 : index
    %c0_23 = arith.constant 0 : index
    %24 = vector.load %arg2[%c0_21, %23, %c1_22, %c0_23] : memref<1x18x18x16xbf16, #tpu.memory_space<vmem>>, vector<1x8x16x16xbf16>
    %25 = vector.shape_cast %24 : vector<1x8x16x16xbf16> to vector<8x16x16xbf16>
    %c0_24 = arith.constant 0 : index
    %c0_25 = arith.constant 0 : index
    %c64 = arith.constant 64 : index
    %26 = vector.load %arg6[%c0_24, %c0_25, %c64] : memref<8x16x144xbf16, #tpu.memory_space<vmem>>, vector<8x16x16xbf16>
    tpu.vector_store %arg6[%c0_24, %c0_25, %c64], %25 {strides = array<i32>} : memref<8x16x144xbf16, #tpu.memory_space<vmem>>, vector<8x16x16xbf16>,
    %c1_i32_26 = arith.constant 1 : i32
    %27 = arith.addi %1, %c1_i32_26 : i32
    %c0_27 = arith.constant 0 : index
    %28 = arith.index_cast %27 : i32 to index
    %c2_28 = arith.constant 2 : index
    %c0_29 = arith.constant 0 : index
    %29 = vector.load %arg2[%c0_27, %28, %c2_28, %c0_29] : memref<1x18x18x16xbf16, #tpu.memory_space<vmem>>, vector<1x8x16x16xbf16>
    %30 = vector.shape_cast %29 : vector<1x8x16x16xbf16> to vector<8x16x16xbf16>
    %c0_30 = arith.constant 0 : index
    %c0_31 = arith.constant 0 : index
    %c80 = arith.constant 80 : index
    %31 = vector.load %arg6[%c0_30, %c0_31, %c80] : memref<8x16x144xbf16, #tpu.memory_space<vmem>>, vector<8x16x16xbf16>
    tpu.vector_store %arg6[%c0_30, %c0_31, %c80], %30 {strides = array<i32>} : memref<8x16x144xbf16, #tpu.memory_space<vmem>>, vector<8x16x16xbf16>,
    %c2_i32 = arith.constant 2 : i32
    %32 = arith.addi %1, %c2_i32 : i32
    %c0_32 = arith.constant 0 : index
    %33 = arith.index_cast %32 : i32 to index
    %c0_33 = arith.constant 0 : index
    %c0_34 = arith.constant 0 : index
    %34 = vector.load %arg2[%c0_32, %33, %c0_33, %c0_34] : memref<1x18x18x16xbf16, #tpu.memory_space<vmem>>, vector<1x8x16x16xbf16>
    %35 = vector.shape_cast %34 : vector<1x8x16x16xbf16> to vector<8x16x16xbf16>
    %c0_35 = arith.constant 0 : index
    %c0_36 = arith.constant 0 : index
    %c96 = arith.constant 96 : index
    %36 = vector.load %arg6[%c0_35, %c0_36, %c96] : memref<8x16x144xbf16, #tpu.memory_space<vmem>>, vector<8x16x16xbf16>
    tpu.vector_store %arg6[%c0_35, %c0_36, %c96], %35 {strides = array<i32>} : memref<8x16x144xbf16, #tpu.memory_space<vmem>>, vector<8x16x16xbf16>,
    %c2_i32_37 = arith.constant 2 : i32
    %37 = arith.addi %1, %c2_i32_37 : i32
    %c0_38 = arith.constant 0 : index
    %38 = arith.index_cast %37 : i32 to index
    %c1_39 = arith.constant 1 : index
    %c0_40 = arith.constant 0 : index
    %39 = vector.load %arg2[%c0_38, %38, %c1_39, %c0_40] : memref<1x18x18x16xbf16, #tpu.memory_space<vmem>>, vector<1x8x16x16xbf16>
    %40 = vector.shape_cast %39 : vector<1x8x16x16xbf16> to vector<8x16x16xbf16>
    %c0_41 = arith.constant 0 : index
    %c0_42 = arith.constant 0 : index
    %c112 = arith.constant 112 : index
    %41 = vector.load %arg6[%c0_41, %c0_42, %c112] : memref<8x16x144xbf16, #tpu.memory_space<vmem>>, vector<8x16x16xbf16>
    tpu.vector_store %arg6[%c0_41, %c0_42, %c112], %40 {strides = array<i32>} : memref<8x16x144xbf16, #tpu.memory_space<vmem>>, vector<8x16x16xbf16>,
    %c2_i32_43 = arith.constant 2 : i32
    %42 = arith.addi %1, %c2_i32_43 : i32
    %c0_44 = arith.constant 0 : index
    %43 = arith.index_cast %42 : i32 to index
    %c2_45 = arith.constant 2 : index
    %c0_46 = arith.constant 0 : index
    %44 = vector.load %arg2[%c0_44, %43, %c2_45, %c0_46] : memref<1x18x18x16xbf16, #tpu.memory_space<vmem>>, vector<1x8x16x16xbf16>
    %45 = vector.shape_cast %44 : vector<1x8x16x16xbf16> to vector<8x16x16xbf16>
    %c0_47 = arith.constant 0 : index
    %c0_48 = arith.constant 0 : index
    %c128 = arith.constant 128 : index
    %46 = vector.load %arg6[%c0_47, %c0_48, %c128] : memref<8x16x144xbf16, #tpu.memory_space<vmem>>, vector<8x16x16xbf16>
    tpu.vector_store %arg6[%c0_47, %c0_48, %c128], %45 {strides = array<i32>} : memref<8x16x144xbf16, #tpu.memory_space<vmem>>, vector<8x16x16xbf16>,
    %c0_49 = arith.constant 0 : index
    %c0_50 = arith.constant 0 : index
    %c0_51 = arith.constant 0 : index
    %47 = vector.load %arg6[%c0_49, %c0_50, %c0_51] : memref<8x16x144xbf16, #tpu.memory_space<vmem>>, vector<8x16x144xbf16>
    %48 = vector.shape_cast %47 : vector<8x16x144xbf16> to vector<128x144xbf16>
    %c0_52 = arith.constant 0 : index
    %c0_53 = arith.constant 0 : index
    %49 = vector.load %arg3[%c0_52, %c0_53] : memref<144x128xbf16, #tpu.memory_space<vmem>>, vector<144x128xbf16>
    %cst = arith.constant dense<0.000000e+00> : vector<128x128xf32>
    %50 = tpu.matmul %48, %49, %cst {dimension_numbers = #tpu.dot_dimension_numbers<[1], [0], [0], [1], [0, 0, 1, 1], [], []>} : vector<128x144xbf16>, vector<144x128xbf16>, vector<128x128xf32> -> vector<128x128xf32>
    %c0_54 = arith.constant 0 : index
    %c0_55 = arith.constant 0 : index
    %51 = vector.load %arg4[%c0_54, %c0_55] : memref<1x128xf32, #tpu.memory_space<vmem>>, vector<1x128xf32>
    %52 = vector.broadcast %51 : vector<1x128xf32> to vector<128x128xf32>
    %53 = arith.addf %50, %52 : vector<128x128xf32>
    %cst_56 = arith.constant 0.000000e+00 : f32
    %54 = vector.broadcast %cst_56 : f32 to vector<128x128xf32>
    %55 = arith.maximumf %53, %54 : vector<128x128xf32>
    %56 = vector.shape_cast %55 : vector<128x128xf32> to vector<8x16x128xf32>
    %c0_57 = arith.constant 0 : index
    %c0_58 = arith.constant 0 : index
    %c0_59 = arith.constant 0 : index
    %c0_60 = arith.constant 0 : index
    %57 = vector.load %arg5[%c0_57, %c0_58, %c0_59, %c0_60] : memref<1x8x16x128xf32, #tpu.memory_space<vmem>>, vector<1x8x16x128xf32>
    %58 = vector.shape_cast %57 : vector<1x8x16x128xf32> to vector<8x16x128xf32>
    %59 = vector.shape_cast %56 : vector<8x16x128xf32> to vector<1x8x16x128xf32>
    tpu.vector_store %arg5[%c0_57, %c0_58, %c0_59, %c0_60], %59 {strides = array<i32>} : memref<1x8x16x128xf32, #tpu.memory_space<vmem>>, vector<1x8x16x128xf32>,
    return
  }
  func.func @transform_0(%arg0: i32, %arg1: i32) -> (i32, i32, i32, i32) {
    %c0_i32 = arith.constant 0 : i32
    %c0_i32_0 = arith.constant 0 : i32
    %c0_i32_1 = arith.constant 0 : i32
    %c0_i32_2 = arith.constant 0 : i32
    return %arg0, %c0_i32, %c0_i32_0, %c0_i32_1 : i32, i32, i32, i32
  }
  func.func @transform_1(%arg0: i32, %arg1: i32) -> (i32, i32) {
    %c0_i32 = arith.constant 0 : i32
    %c0_i32_0 = arith.constant 0 : i32
    %c0_i32_1 = arith.constant 0 : i32
    return %c0_i32, %c0_i32_0 : i32, i32
  }
  func.func @transform_2(%arg0: i32, %arg1: i32) -> (i32, i32) {
    %c0_i32 = arith.constant 0 : i32
    %c0_i32_0 = arith.constant 0 : i32
    %c0_i32_1 = arith.constant 0 : i32
    return %c0_i32, %c0_i32_0 : i32, i32
  }
  func.func @transform_3(%arg0: i32, %arg1: i32) -> (i32, i32, i32, i32) {
    %c0_i32 = arith.constant 0 : i32
    %c0_i32_0 = arith.constant 0 : i32
    %c0_i32_1 = arith.constant 0 : i32
    return %arg0, %arg1, %c0_i32, %c0_i32_0 : i32, i32, i32, i32
  }
}

</mosaic_0001>

<bundles_post_ra>
// kernel: tpu_custom_call.1
= control target key start
LH: loop header
LB: loop body
LE: loop exit
PB: predicated region body
PF: predicated region fallthrough
CT: control target
= control target key end

     0   :  { %8 = vsyncpa [#allocation4], 0  ;;  %s3058_s0 = inlined_call_operand.vmem [shape: bf16[2,18,18,16], index: 0, kind: input, shape index: {}]   ;;  %s3059_s1 = inlined_call_operand.vmem [shape: bf16[144,128], index: 1, kind: input, shape index: {}]   ;;  %s3060_s2 = inlined_call_operand.vmem [shape: f32[1,128], index: 2, kind: input, shape index: {}]   ;;  %s3061_s3 = inlined_call_operand.hbm [shape: f32[2,16,16,128], index: 3, kind: output, shape index: {}]  }
   0x1   :  { %10 = vsyncpa [#allocation4 + $0x1], 0  ;;  %s2515_s12 = smov 0   ;;  %s2517_s13 = smov 0  }
   0x2   :  { %s2519_s14 = smov 0   ;;  %s2521_s15 = smov 0  }
   0x3   :  { %s2523_s16 = smov 0   ;;  %s2525_s17 = smov 0  }
   0x4   :  { %s2527_s18 = smov 0   ;;  %s2529_s19 = smov 0  }
   0x5 LB: > { %s1870_s20 = sadd.s32 4294967295, %s2482_s19   ;;  %s1871_s21 = sadd.s32 4294967294, %s2482_s19   ;;  %s2482_s19 = sphi %s2529_s19, %s16_s19   ;;  %s2478_s18 = sphi %s2527_s18, %s3070_s18   ;;  %s2474_s17 = sphi %s2525_s17, %s3069_s17   ;;  %s2470_s16 = sphi %s2523_s16, %s3068_s16   ;;  %s2466_s15 = sphi %s2521_s15, %s3067_s15   ;;  %s2462_s14 = sphi %s2519_s14, %s3066_s14   ;;  %s2458_s13 = sphi %s2517_s13, %s3065_s13   ;;  %s2454_s12 = sphi %s2515_s12, %s3064_s12  }
   0x6   : > { %s25_s22 = sadd.s32 1, %s2474_s17  ;;  %s28_s23 = sadd.s32 1, %s2478_s18 }
   0x7   : > { %p26_p0 = scmp.ge.s32.totalorder %s25_s22, 2  ;;  %p115_p1 = scmp.ne.s32.totalorder %s2462_s14, %s2458_s13 }
   0x8   : > { %p116_p2 = scmp.eq.s32.totalorder %s1870_s20, 3  ;;  %p121_p5 = scmp.ne.s32.totalorder %s2458_s13, %s2454_s12 }
   0x9   : > { %s3072_s22 = smov (%p26_p0, %s25_s22), 0  ;;  %s3074_s23 = smov (!%p26_p0, %s28_s23), %s2478_s18 }
   0xa   : > { %s101_s24 = ssub.s32 %s2474_s17, %s3072_s22  ;;  %p2566_p3 = por %p116_p2, %p115_p1 }
   0xb   : > { %p30_p4 = scmp.ge.s32.totalorder %s3074_s23, 2  ;;  %p122_p6 = scmp.eq.s32.totalorder %s1871_s21, 3 }
   0xc   : > { %p1874_p7 = scmp.ge.s32.totalorder %s2482_s19, 1  ;;  %p154_p9 = scmp.lt.s32.totalorder %s2482_s19, 5 }
   0xd   : > { %s3076_s23 = smov (%p30_p4, %s3074_s23), 0  ;;  %p2575_p8 = por %p122_p6, %p121_p5 }
   0xe   : > { %s100_s27 = ssub.s32 %s2478_s18, %s3076_s23  ;;  %s105_s28 = sadd.s32 1, %s2462_s14 }
   0xf   : > { %s102_s29 = sor.u32 %s101_s24, %s100_s27  ;;  %p155_p10 = pnand %p1874_p7, %p154_p9 }
  0x10   : > { %p103_p11 = scmp.eq.s32.totalorder %s102_s29, 0  ;;  %p178_p12 = scmp.lt.s32.totalorder (!%p155_p10), %s2470_s16, 1  ;;  %v2484_v0 = vmov (!%p155_p10), 0   ;;  %v2355_v1 = vld [vmem:[%s3059_s1] sm:$0xff] (!%p155_p10)   ;;  %v2356_v2 = vld [vmem:[%s3059_s1 + $0x8] sm:$0xff] (!%p155_p10)   ;;  %vm568_vm0 = vcmask (!%p155_p10), 1046528  }
  0x11   : > { %158 = sbr.rel (%p155_p10) target bundleno = 497 (0x1f1), region = 32  ;;  %1638 = vmatprep.subr.bf16.mxu0 (!%p155_p10), %v2484_v0  ;;  %2159 = vmatprep.subr.bf16.mxu1 (!%p155_p10), %v2484_v0  ;;  %v2357_v3 = vld [vmem:[%s3059_s1 + $0x10] sm:$0xff] (!%p155_p10)   ;;  %s2485_s29 = smov (!%p155_p10), 48   ;;  %vm350_vm1 = vsmask.f32 (!%p155_p10), 7424  ;;  %vm253_vm2 = vcmask (!%p155_p10), 130048  }
  0x12   : > { %s2584_s30 = scalar_select %p103_p11, %s2462_s14, %s105_s28  }
  0x13   : > { %s2157_s7 = smul.u32 (!%p155_p10), 96, %s2466_s15  ;;  %1639 = vmatpush1.bf16.msra.mxu0 (!%p155_p10), %v2355_v1  ;;  %2168 = vmatpush1.bf16.msra.mxu1 (!%p155_p10), %v2355_v1  ;;  %s2487_s5 = smov (!%p155_p10), 32   ;;  %vm471_vm3 = vcmask (!%p155_p10), 261248   ;;  %vm617_vm4 = vcmask (!%p155_p10), 392448   ;;  %vm710_vm5 = vcmask (!%p155_p10), 523648   ;;  %vm927_vm6 = vcmask (!%p155_p10), 654848  }
  0x14   : > { %1640 = vmatprep.subr.bf16.mxu0 (!%p155_p10), %v2484_v0  ;;  %2160 = vmatprep.subr.bf16.mxu1 (!%p155_p10), %v2484_v0  ;;  %s2488_s6 = smov (!%p155_p10), 16   ;;  %s2491_s9 = smov (!%p155_p10), 112   ;;  %vm1072_vm7 = vcmask (!%p155_p10), 786048   ;;  %vm1165_vm8 = vcmask (!%p155_p10), 917248   ;;  %vm1382_vm9 = vcmask (!%p155_p10), 1048448  }
  0x15   : > { %s2153_s24 = sshll.u32 (!%p155_p10), %s2470_s16, 5 }
  0x17   : > { %1641 = vmatpush1.bf16.msra.mxu0 (!%p155_p10), %v2356_v2  ;;  %2169 = vmatpush1.bf16.msra.mxu1 (!%p155_p10), %v2356_v2 }
  0x18   : > { %s179_s4 = scalar_select %p178_p12, %s2470_s16, 1  ;;  %1642 = vmatprep.subr.bf16.mxu0 %v2484_v0  ;;  %2161 = vmatprep.subr.bf16.mxu1 %v2484_v0 }
  0x1a   : > { %s2177_s8 = smul.u32 216, %s179_s4  ;;  %s2486_s4 = smov 80  }
  0x1b   : > { %1643 = vmatpush1.bf16.msra.mxu0 %v2357_v3  ;;  %2170 = vmatpush1.bf16.msra.mxu1 %v2357_v3 }
  0x1c   : > { %s182_s21 = scalar_lea.vmem %s3058_s0, %s2177_s8  ;;  %1644 = vmatprep.subr.bf16.mxu0 %v2484_v0  ;;  %2162 = vmatprep.subr.bf16.mxu1 %v2484_v0  ;;  %s2490_s8 = smov 96  }
  0x1d   : > { %s2605_s28 = scalar_lea.vmem %s182_s21, %s2157_s7  ;;  %s2489_s7 = smov 64  }
  0x1e   : > { %v2259_v4 = vld [vmem:[%s2605_s28 + $0x3c] sm:$0xff]   ;;  %v2260_v5 = vld [vmem:[%s2605_s28 + $0xc] sm:$0xff]   ;;  %v2262_v7 = vld [vmem:[%s2605_s28 + $0x14] ss:$0 sps:$4 sm:$0x11]   ;;  %s2158_s21 = sshll.u32 %s2466_s15, 4 }
  0x1f   : > { %694 = vrot.lane.b32.xlu1 %v2259_v4, %s2485_s29  ;;  %686 = vrot.lane.b32.xlu0 %v2260_v5, %s2485_s29  ;;  %v2261_v6 = vld [vmem:[%s2605_s28 + $0xc] sm:$0xfe]   ;;  %v2267_v8 = vld [vmem:[%s2605_s28] sm:$0xff]   ;;  %v1025_v10 = vrot.slane %v2262_v7, 1  ;;  %s1781_s27 = sadd.s32 %s2158_s21, %s2153_s24 }
  0x20   : > { %v1024_v9 = vrot.slane %v2261_v6, 1  ;;  %v2263_v11 = vld [vmem:[%s2605_s28] sm:$0xfe]   ;;  %v2264_v12 = vld [vmem:[%s2605_s28 + $0x8] ss:$0 sps:$4 sm:$0x11]  }
  0x21   : > { %v352_v13 = vshrl.u32 %v2267_v8, 16  ;;  %v569_v15 = vrot.slane %v2263_v11, 1  ;;  %v2265_v16 = vld [vmem:[%s2605_s28 + $0x30] sm:$0xfe]   ;;  %v354_v17 = vshll.u32 %v2267_v8, 16  ;;  %v570_v18 = vrot.slane %v2264_v12, 1 }
  0x22   : > { %v1026_v14 = vsel %vm568_vm0, %v1024_v9, %v1025_v10  ;;  %v2266_v19 = vld [vmem:[%s2605_s28 + $0x38] ss:$0 sps:$4 sm:$0x11]   ;;  %v581_v20 = vrot.slane %v2265_v16, 1  ;;  %v2269_v25 = vld [vmem:[%s2605_s28 + $0x3c] sm:$0xfe]  }
  0x23   : > { %1048 = vrot.lane.b32.xlu0 %v1026_v14, %s2486_s4  ;;  %v356_v21 = vrot.slane %v354_v17, 1  ;;  %v571_v22 = vsel %vm568_vm0, %v569_v15, %v570_v18  ;;  %v582_v23 = vrot.slane %v2266_v19, 1  ;;  %v2268_v24 = vld [vmem:[%s2605_s28 + $0x8] ss:$0 sps:$4 sm:$0x11]   ;;  %v1036_v30 = vrot.slane %v2269_v25, 1 }
  0x24   : > { %593 = vrot.lane.b32.xlu1 %v571_v22, %s2487_s5  ;;  %v359_v28 = vshll.u32 %v2268_v24, 16  ;;  %v2270_v29 = vld [vmem:[%s2605_s28 + $0x44] ss:$0 sps:$4 sm:$0x11]   ;;  %v2271_v31 = vld [vmem:[%s2605_s28 + $0x30] sm:$0xff]   ;;  %v2273_v35 = vld [vmem:[%s2605_s28 + $0x3c] sm:$0xff]  }
  0x25   : > { %v583_v26 = vsel %vm568_vm0, %v581_v20, %v582_v23  ;;  %v357_v27 = vor.u32 %v356_v21, %v352_v13  ;;  %v1037_v33 = vrot.slane %v2270_v29, 1  ;;  %v2272_v34 = vld [vmem:[%s2605_s28 + $0x38] ss:$0 sps:$4 sm:$0x11]   ;;  %v400_v36 = vshrl.u32 %v2271_v31, 16  ;;  %v2275_v45 = vld [vmem:[%s2605_s28 + $0xc] sm:$0xff]  }
  0x26   : > { %v361_v32 = vrot.slane %v359_v28, 1  ;;  %v402_v37 = vshll.u32 %v2271_v31, 16  ;;  %v407_v40 = vshll.u32 %v2272_v34, 16  ;;  %v2274_v41 = vld [vmem:[%s2605_s28 + $0x44] ss:$0 sps:$4 sm:$0x11]  }
  0x27   : > { %v1038_v39 = vsel %vm568_vm0, %v1036_v30, %v1037_v33  ;;  %v856_v43 = vshrl.u32 %v2273_v35, 16  ;;  %v858_v44 = vshll.u32 %v2273_v35, 16  ;;  %v863_v47 = vshll.u32 %v2274_v41, 16  ;;  %v2276_v50 = vld [vmem:[%s2605_s28 + $0x14] ss:$0 sps:$4 sm:$0x11]  }
  0x28   : > { %601 = vrot.lane.b32.xlu1 %v583_v26, %s2487_s5  ;;  %v362_v38 = vsel %vm350_vm1, %v357_v27, %v361_v32  ;;  %v404_v42 = vrot.slane %v402_v37, 1  ;;  %v409_v46 = vrot.slane %v407_v40, 1  ;;  %v808_v51 = vshrl.u32 %v2275_v45, 16  ;;  %v2277_v58 = vld [vmem:[%s2605_s28 + $0x48] sm:$0xff]   ;;  %v2278_v63 = vld [vmem:[%s2605_s28 + $0x18] sm:$0xff]   ;;  %s2154_s15 = sshll.u32 %s1781_s27, 7 }
  0x29   : > { %447 = vrot.lane.b32.xlu0 %v362_v38, %s2488_s6  ;;  %v860_v49 = vrot.slane %v858_v44, 1  ;;  %v810_v52 = vshll.u32 %v2275_v45, 16  ;;  %v865_v53 = vrot.slane %v863_v47, 1  ;;  %v815_v57 = vshll.u32 %v2276_v50, 16  ;;  %v2279_v62 = vld [vmem:[%s2605_s28 + $0x48] sm:$0xff]   ;;  %v2281_v2 = vld [vmem:[%s2605_s28 + $0x18] sm:$0xff]  }
  0x2a   : > { %v405_v48 = vor.u32 %v404_v42, %v400_v36  ;;  %v2280_v1 = vld [vmem:[%s2605_s28 + $0x50] ss:$0 sps:$4 sm:$0x11]   ;;  %v1311_v4 = vshrl.u32 %v2279_v62, 16  ;;  %v1313_v5 = vshll.u32 %v2279_v62, 16  ;;  %v1263_v8 = vshrl.u32 %v2281_v2, 16 }
  0x2b   : > { %v861_v55 = vor.u32 %v860_v49, %v856_v43  ;;  %v812_v56 = vrot.slane %v810_v52, 1  ;;  %v817_v61 = vrot.slane %v815_v57, 1  ;;  %v1318_v6 = vshll.u32 %v2280_v1, 16  ;;  %v2282_v7 = vld [vmem:[%s2605_s28 + $0x20] ss:$0 sps:$4 sm:$0x11]  }
  0x2c   : > { %1056 = vrot.lane.b32.xlu1 %v1038_v39, %s2486_s4  ;;  %v410_v54 = vsel %vm350_vm1, %v405_v48, %v409_v46  ;;  %v1265_v9 = vshll.u32 %v2281_v2, 16  ;;  %v1315_v10 = vrot.slane %v1313_v5, 1  ;;  %v2283_v11 = vld [vmem:[%s2605_s28 + $0x3c] sm:$0xff]   ;;  %v1270_v14 = vshll.u32 %v2282_v7, 16  ;;  %v2285_v22 = vld [vmem:[%s2605_s28 + $0xc] sm:$0xff]   ;;  %v2303_v2 = vld [vmem:[%s2605_s28 + $0x54] sm:$0xff]  }
  0x2d   : > { %455 = vrot.lane.b32.xlu0 %v410_v54, %s2488_s6  ;;  %v866_v59 = vsel %vm350_vm1, %v861_v55, %v865_v53  ;;  %v813_v60 = vor.u32 %v812_v56, %v808_v51  ;;  %v1320_v12 = vrot.slane %v1318_v6, 1  ;;  %v2284_v15 = vld [vmem:[%s2605_s28 + $0x44] ss:$0 sps:$4 sm:$0x11]   ;;  %v412_v17 = vshrl.u32 %v2283_v11, 16  ;;  %v2293_v33 = vld [vmem:[%s2605_s28 + $0x48] sm:$0xff]  }
  0x2e   : > { %v1267_v13 = vrot.slane %v1265_v9, 1  ;;  %v1316_v16 = vor.u32 %v1315_v10, %v1311_v4  ;;  %v414_v18 = vshll.u32 %v2283_v11, 16  ;;  %v1272_v20 = vrot.slane %v1270_v14, 1  ;;  %v2286_v25 = vld [vmem:[%s2605_s28 + $0x14] ss:$0 sps:$4 sm:$0x11]  }
  0x2f   : > { %v818_v3 = vsel %vm350_vm1, %v813_v60, %v817_v61  ;;  %v419_v21 = vshll.u32 %v2284_v15, 16  ;;  %v364_v28 = vshrl.u32 %v2285_v22, 16  ;;  %v366_v29 = vshll.u32 %v2285_v22, 16  ;;  %v2287_v32 = vld [vmem:[%s2605_s28 + $0x3c] sm:$0xfe]   ;;  %v2291_v47 = vld [vmem:[%s2605_s28 + $0x48] sm:$0xff]  }
  0x30   : > { %911 = vrot.lane.b32.xlu1 %v866_v59, %s2489_s7  ;;  %v1268_v19 = vor.u32 %v1267_v13, %v1263_v8  ;;  %v1321_v23 = vsel %vm350_vm1, %v1316_v16, %v1320_v12  ;;  %v416_v24 = vrot.slane %v414_v18, 1  ;;  %v371_v31 = vshll.u32 %v2286_v25, 16  ;;  %v2288_v35 = vld [vmem:[%s2605_s28 + $0x44] ss:$0 sps:$4 sm:$0x11]   ;;  %v2295_v52 = vld [vmem:[%s2605_s28 + $0x18] sm:$0xff]  }
  0x31   : > { %903 = vrot.lane.b32.xlu0 %v818_v3, %s2489_s7  ;;  %v421_v27 = vrot.slane %v419_v21, 1  ;;  %v368_v34 = vrot.slane %v366_v29, 1  ;;  %v584_v38 = vrot.slane %v2287_v32, 1  ;;  %v585_v40 = vrot.slane %v2288_v35, 1  ;;  %v2289_v41 = vld [vmem:[%s2605_s28 + $0xc] sm:$0xfe]  }
  0x32   : > { %v1273_v26 = vsel %vm350_vm1, %v1268_v19, %v1272_v20  ;;  %v417_v30 = vor.u32 %v416_v24, %v412_v17  ;;  %v373_v37 = vrot.slane %v371_v31, 1  ;;  %v2290_v42 = vld [vmem:[%s2605_s28 + $0x14] ss:$0 sps:$4 sm:$0x11]   ;;  %v572_v45 = vrot.slane %v2289_v41, 1  ;;  %v2292_v53 = vld [vmem:[%s2605_s28 + $0x18] sm:$0xff]  }
  0x33   : > { %v369_v39 = vor.u32 %v368_v34, %v364_v28  ;;  %v586_v44 = vsel %vm568_vm0, %v584_v38, %v585_v40  ;;  %v573_v46 = vrot.slane %v2290_v42, 1  ;;  %v868_v48 = vshrl.u32 %v2293_v33, 16  ;;  %v2294_v51 = vld [vmem:[%s2605_s28 + $0x50] ss:$0 sps:$4 sm:$0x11]   ;;  %v2301_v14 = vld [vmem:[%s2605_s28 + $0x54] sm:$0xff]  }
  0x34   : > { %1149 = vrot.lane.b32.xlu1 %v2277_v58, %s2490_s8  ;;  %v422_v36 = vsel %vm350_vm1, %v417_v30, %v421_v27  ;;  %v870_v49 = vshll.u32 %v2293_v33, 16  ;;  %v875_v55 = vshll.u32 %v2294_v51, 16  ;;  %v2296_v56 = vld [vmem:[%s2605_s28 + $0x20] ss:$0 sps:$4 sm:$0x11]   ;;  %v820_v57 = vshrl.u32 %v2295_v52, 16 }
  0x35   : > { %1141 = vrot.lane.b32.xlu0 %v2278_v63, %s2490_s8  ;;  %v374_v43 = vsel %vm350_vm1, %v369_v39, %v373_v37  ;;  %v574_v50 = vsel %vm568_vm0, %v572_v45, %v573_v46  ;;  %v822_v58 = vshll.u32 %v2295_v52, 16  ;;  %v827_v62 = vshll.u32 %v2296_v56, 16  ;;  %v2297_v63 = vld [vmem:[%s2605_s28 + $0x48] sm:$0xfe]   ;;  %v2299_v8 = vld [vmem:[%s2605_s28 + $0x18] sm:$0xfe]  }
  0x36   : > { %v872_v54 = vrot.slane %v870_v49, 1  ;;  %v877_v60 = vrot.slane %v875_v55, 1  ;;  %v2298_v1 = vld [vmem:[%s2605_s28 + $0x50] ss:$0 sps:$4 sm:$0x11]   ;;  %v1039_v6 = vrot.slane %v2297_v63, 1 }
  0x37   : > { %v824_v61 = vrot.slane %v822_v58, 1  ;;  %v829_v5 = vrot.slane %v827_v62, 1  ;;  %v1040_v7 = vrot.slane %v2298_v1, 1  ;;  %v2300_v9 = vld [vmem:[%s2605_s28 + $0x20] ss:$0 sps:$4 sm:$0x11]  }
  0x38   : > { %1366 = vrot.lane.b32.xlu1 %v1321_v23, %s2491_s9  ;;  %v873_v59 = vor.u32 %v872_v54, %v868_v48  ;;  %v1027_v12 = vrot.slane %v2299_v8, 1  ;;  %v1028_v13 = vrot.slane %v2300_v9, 1  ;;  %v1323_v15 = vshrl.u32 %v2303_v2, 16  ;;  %v2304_v17 = vld [vmem:[%s2605_s28 + $0x5c] ss:$0 sps:$4 sm:$0x11]  }
  0x39   : > { %1358 = vrot.lane.b32.xlu0 %v1273_v26, %s2491_s9  ;;  %v825_v4 = vor.u32 %v824_v61, %v820_v57  ;;  %v1041_v11 = vsel %vm568_vm0, %v1039_v6, %v1040_v7  ;;  %v1325_v16 = vshll.u32 %v2303_v2, 16  ;;  %v2305_v18 = vld [vmem:[%s2605_s28 + $0x24] sm:$0xff]   ;;  %v1330_v23 = vshll.u32 %v2304_v17, 16  ;;  %v2306_v24 = vld [vmem:[%s2605_s28 + $0x2c] ss:$0 sps:$4 sm:$0x11]  }
  0x3a   : > { %v878_v3 = vsel %vm350_vm1, %v873_v59, %v877_v60  ;;  %v1029_v19 = vsel %vm568_vm0, %v1027_v12, %v1028_v13  ;;  %v2307_v21 = vld [vmem:[%s2605_s28 + $0x48] sm:$0xff]   ;;  %v1275_v25 = vshrl.u32 %v2305_v18, 16  ;;  %v1277_v26 = vshll.u32 %v2305_v18, 16  ;;  %v2308_v31 = vld [vmem:[%s2605_s28 + $0x50] ss:$0 sps:$4 sm:$0x11]  }
  0x3b   : > { %v830_v10 = vsel %vm350_vm1, %v825_v4, %v829_v5  ;;  %v1327_v20 = vrot.slane %v1325_v16, 1  ;;  %v2302_v22 = vld [vmem:[%s2605_s28 + $0x24] sm:$0xff]   ;;  %v1332_v28 = vrot.slane %v1330_v23, 1  ;;  %v1282_v30 = vshll.u32 %v2306_v24, 16  ;;  %v2309_v38 = vld [vmem:[%s2605_s28 + $0x18] sm:$0xff]  }
  0x3c   : > { %457 = vrot.lane.b32.xlu1 %v422_v36, %s2488_s6  ;;  %v1279_v29 = vrot.slane %v1277_v26, 1  ;;  %v424_v32 = vshrl.u32 %v2307_v21, 16  ;;  %v426_v33 = vshll.u32 %v2307_v21, 16  ;;  %v431_v37 = vshll.u32 %v2308_v31, 16  ;;  %v2317_v48 = vld [vmem:[%s2605_s28 + $0x54] sm:$0xff]   ;;  %v2319_v2 = vld [vmem:[%s2605_s28 + $0x24] sm:$0xff]  }
  0x3d   : > { %449 = vrot.lane.b32.xlu0 %v374_v43, %s2488_s6  ;;  %v1328_v27 = vor.u32 %v1327_v20, %v1323_v15  ;;  %v1284_v36 = vrot.slane %v1282_v30, 1  ;;  %v2310_v40 = vld [vmem:[%s2605_s28 + $0x20] ss:$0 sps:$4 sm:$0x11]   ;;  %v376_v42 = vshrl.u32 %v2309_v38, 16  ;;  %v378_v43 = vshll.u32 %v2309_v38, 16 }
  0x3e   : > { %v1280_v35 = vor.u32 %v1279_v29, %v1275_v25  ;;  %v428_v39 = vrot.slane %v426_v33, 1  ;;  %v433_v41 = vrot.slane %v431_v37, 1  ;;  %v383_v46 = vshll.u32 %v2310_v40, 16  ;;  %v2313_v56 = vld [vmem:[%s2605_s28 + $0x18] sm:$0xfe]   ;;  %v2327_v17 = vld [vmem:[%s2605_s28 + $0x60] sm:$0xff]  }
  0x3f   : > { %v1333_v34 = vsel %vm350_vm1, %v1328_v27, %v1332_v28  ;;  %v380_v49 = vrot.slane %v378_v43, 1  ;;  %v2314_v57 = vld [vmem:[%s2605_s28 + $0x20] ss:$0 sps:$4 sm:$0x11]   ;;  %v575_v60 = vrot.slane %v2313_v56, 1  ;;  %v880_v62 = vshrl.u32 %v2317_v48, 16 }
  0x40   : > { %603 = vrot.lane.b32.xlu1 %v586_v44, %s2487_s5  ;;  %v1285_v44 = vsel %vm350_vm1, %v1280_v35, %v1284_v36  ;;  %v429_v45 = vor.u32 %v428_v39, %v424_v32  ;;  %v385_v52 = vrot.slane %v383_v46, 1  ;;  %v576_v61 = vrot.slane %v2314_v57, 1  ;;  %v2318_v1 = vld [vmem:[%s2605_s28 + $0x5c] ss:$0 sps:$4 sm:$0x11]   ;;  %v2315_v4 = vld [vmem:[%s2605_s28 + $0x54] sm:$0xff]  }
  0x41   : > { %595 = vrot.lane.b32.xlu0 %v574_v50, %s2487_s5  ;;  %v2312_v50 = vld [vmem:[%s2605_s28 + $0x50] ss:$0 sps:$4 sm:$0x11]   ;;  %v381_v54 = vor.u32 %v380_v49, %v376_v42  ;;  %v882_v63 = vshll.u32 %v2317_v48, 16  ;;  %v887_v6 = vshll.u32 %v2318_v1, 16  ;;  %v832_v8 = vshrl.u32 %v2319_v2, 16 }
  0x42   : > { %v434_v51 = vsel %vm350_vm1, %v429_v45, %v433_v41  ;;  %v588_v55 = vrot.slane %v2312_v50, 1  ;;  %v2320_v7 = vld [vmem:[%s2605_s28 + $0x2c] ss:$0 sps:$4 sm:$0x11]   ;;  %v834_v9 = vshll.u32 %v2319_v2, 16  ;;  %v1335_v29 = vshrl.u32 %v2327_v17, 16 }
  0x43   : > { %v386_v58 = vsel %vm350_vm1, %v381_v54, %v385_v52  ;;  %v884_v5 = vrot.slane %v882_v63, 1  ;;  %v889_v12 = vrot.slane %v887_v6, 1  ;;  %v2321_v15 = vld [vmem:[%s2605_s28 + $0x54] sm:$0xfe]   ;;  %v2323_v23 = vld [vmem:[%s2605_s28 + $0x24] sm:$0xfe]  }
  0x44   : > { %696 = vrot.lane.b32.xlu1 %v2291_v47, %s2485_s29  ;;  %v2311_v47 = vld [vmem:[%s2605_s28 + $0x48] sm:$0xfe]   ;;  %v836_v13 = vrot.slane %v834_v9, 1  ;;  %v2322_v16 = vld [vmem:[%s2605_s28 + $0x5c] ss:$0 sps:$4 sm:$0x11]  }
  0x45   : > { %688 = vrot.lane.b32.xlu0 %v2292_v53, %s2485_s29  ;;  %v587_v53 = vrot.slane %v2311_v47, 1  ;;  %v1042_v21 = vrot.slane %v2321_v15, 1  ;;  %v2324_v24 = vld [vmem:[%s2605_s28 + $0x2c] ss:$0 sps:$4 sm:$0x11]   ;;  %v1030_v26 = vrot.slane %v2323_v23, 1 }
  0x46   : > { %v1031_v27 = vrot.slane %v2324_v24, 1  ;;  %v1337_v30 = vshll.u32 %v2327_v17, 16  ;;  %v2325_v31 = vld [vmem:[%s2605_s28 + $0x60] sm:$0xff]   ;;  %v2328_v32 = vld [vmem:[%s2605_s28 + $0x68] ss:$0 sps:$4 sm:$0x11]  }
  0x47   : > { %v589_v59 = vsel %vm568_vm0, %v587_v53, %v588_v55  ;;  %v2329_v33 = vld [vmem:[%s2605_s28 + $0x30] sm:$0xff]   ;;  %v1342_v37 = vshll.u32 %v2328_v32, 16  ;;  %v2330_v38 = vld [vmem:[%s2605_s28 + $0x38] ss:$0 sps:$4 sm:$0x11]   ;;  %v2333_v52 = vld [vmem:[%s2605_s28 + $0x24] sm:$0xff]  }
  0x48   : > { %913 = vrot.lane.b32.xlu1 %v878_v3, %s2489_s7  ;;  %v577_v3 = vsel %vm568_vm0, %v575_v60, %v576_v61  ;;  %v2331_v35 = vld [vmem:[%s2605_s28 + $0x54] sm:$0xff]   ;;  %v1032_v36 = vsel %vm568_vm0, %v1030_v26, %v1031_v27  ;;  %v1287_v39 = vshrl.u32 %v2329_v33, 16  ;;  %v1289_v40 = vshll.u32 %v2329_v33, 16  ;;  %v2332_v46 = vld [vmem:[%s2605_s28 + $0x5c] ss:$0 sps:$4 sm:$0x11]  }
  0x49   : > { %905 = vrot.lane.b32.xlu0 %v830_v10, %s2489_s7  ;;  %v885_v10 = vor.u32 %v884_v5, %v880_v62  ;;  %v2326_v41 = vld [vmem:[%s2605_s28 + $0x30] sm:$0xff]   ;;  %v1344_v43 = vrot.slane %v1342_v37, 1  ;;  %v1294_v45 = vshll.u32 %v2330_v38, 16  ;;  %v436_v47 = vshrl.u32 %v2331_v35, 16  ;;  %v2341_v62 = vld [vmem:[%s2605_s28 + $0x60] sm:$0xff]  }
  0x4a   : > { %v438_v48 = vshll.u32 %v2331_v35, 16  ;;  %v2334_v55 = vld [vmem:[%s2605_s28 + $0x2c] ss:$0 sps:$4 sm:$0x11]   ;;  %v388_v57 = vshrl.u32 %v2333_v52, 16  ;;  %v894_v15 = vshll.u32 %v2341_v62, 16 }
  0x4b   : > { %v890_v18 = vsel %vm350_vm1, %v885_v10, %v889_v12  ;;  %v1296_v50 = vrot.slane %v1294_v45, 1  ;;  %v395_v60 = vshll.u32 %v2334_v55, 16  ;;  %v2335_v61 = vld [vmem:[%s2605_s28 + $0x54] sm:$0xfe]   ;;  %v2351_v32 = vld [vmem:[%s2605_s28 + $0x6c] sm:$0xff]   ;;  %v2358_v55 = vld [vmem:[%s2605_s28] sm:$0xff]  }
  0x4c   : > { %1058 = vrot.lane.b32.xlu1 %v1041_v11, %s2486_s4  ;;  %v2316_v11 = vld [vmem:[%s2605_s28 + $0x24] sm:$0xff]   ;;  %v440_v54 = vrot.slane %v438_v48, 1  ;;  %v2336_v2 = vld [vmem:[%s2605_s28 + $0x5c] ss:$0 sps:$4 sm:$0x11]   ;;  %v590_v5 = vrot.slane %v2335_v61, 1 }
  0x4d   : > { %1050 = vrot.lane.b32.xlu0 %v1029_v19, %s2486_s4  ;;  %v837_v19 = vor.u32 %v836_v13, %v832_v8  ;;  %v2337_v8 = vld [vmem:[%s2605_s28 + $0x24] sm:$0xfe]   ;;  %v2338_v9 = vld [vmem:[%s2605_s28 + $0x2c] ss:$0 sps:$4 sm:$0x11]   ;;  %v2343_v17 = vld [vmem:[%s2605_s28 + $0x30] sm:$0xff]  }
  0x4e   : > { %v579_v12 = vrot.slane %v2338_v9, 1  ;;  %v844_v23 = vshrl.u32 %v2343_v17, 16  ;;  %v846_v24 = vshll.u32 %v2343_v17, 16  ;;  %v2340_v26 = vld [vmem:[%s2605_s28 + $0x30] sm:$0xff]   ;;  %254 = vst.msk [vmem:[#allocation2] sm:$0xff] %vm253_vm2, %v2358_v55 }
  0x4f   : > { %v2347_v38 = vld [vmem:[%s2605_s28 + $0x30] sm:$0xfe]   ;;  %v2370_v17 = vld [vmem:[%s2605_s28 + $0x48] sm:$0xfe]  }
  0x50   : > { %1151 = vrot.lane.b32.xlu1 %v2301_v14, %s2490_s8  ;;  %v839_v14 = vshll.u32 %v2320_v7, 16  ;;  %v591_v7 = vrot.slane %v2336_v2, 1  ;;  %v2360_v61 = vld [vmem:[%s2605_s28 + $0x30] sm:$0xff]  }
  0x51   : > { %1143 = vrot.lane.b32.xlu0 %v2302_v22, %s2490_s8  ;;  %v1043_v22 = vrot.slane %v2322_v16, 1  ;;  %v2342_v16 = vld [vmem:[%s2605_s28 + $0x68] ss:$0 sps:$4 sm:$0x11]   ;;  %258 = vst.msk [vmem:[#allocation2 + $0x40] sm:$0xff] %vm253_vm2, %v2360_v61  ;;  %v2363_v9 = vld [vmem:[%s3059_s1 + $0x30] sm:$0xff]  }
  0x52   : > { %v841_v20 = vrot.slane %v839_v14, 1  ;;  %v592_v13 = vsel %vm568_vm0, %v590_v5, %v591_v7  ;;  %v892_v14 = vshrl.u32 %v2341_v62, 16  ;;  %v2350_v62 = vld [vmem:[%s2605_s28 + $0x3c] sm:$0xff]   ;;  %v2366_v5 = vld [vmem:[%s2605_s28 + $0xc] sm:$0xff]  }
  0x53   : > { %v1044_v28 = vsel %vm568_vm0, %v1042_v21, %v1043_v22  ;;  %v899_v21 = vshll.u32 %v2342_v16, 16  ;;  %v2344_v22 = vld [vmem:[%s2605_s28 + $0x38] ss:$0 sps:$4 sm:$0x11]   ;;  %255 = vst.msk [vmem:[#allocation2 + $0x10] sm:$0xff] %vm253_vm2, %v2366_v5 }
  0x54   : > { %1368 = vrot.lane.b32.xlu1 %v1333_v34, %s2491_s9  ;;  %v842_v25 = vsel %vm350_vm1, %v837_v19, %v841_v20  ;;  %v1339_v34 = vrot.slane %v1337_v30, 1  ;;  %v896_v19 = vrot.slane %v894_v15, 1  ;;  %v2345_v30 = vld [vmem:[%s2605_s28 + $0x60] sm:$0xfe]  }
  0x55   : > { %1360 = vrot.lane.b32.xlu0 %v1285_v44, %s2491_s9  ;;  %v1291_v44 = vrot.slane %v1289_v40, 1  ;;  %v901_v27 = vrot.slane %v899_v21, 1  ;;  %v1045_v35 = vrot.slane %v2345_v30, 1  ;;  %v1033_v40 = vrot.slane %v2347_v38, 1  ;;  %v2380_v38 = vld [vmem:[%s2605_s28 + $0x30] sm:$0xfe]  }
  0x56   : > { %v1340_v42 = vor.u32 %v1339_v34, %v1335_v29  ;;  %v851_v29 = vshll.u32 %v2344_v22, 16  ;;  %v1491_v21 = vrot.slane %v2370_v17, 1 }
  0x57   : > { %v1292_v49 = vor.u32 %v1291_v44, %v1287_v39  ;;  %v2348_v39 = vld [vmem:[%s2605_s28 + $0x38] ss:$0 sps:$4 sm:$0x11]   ;;  %v1349_v44 = vshll.u32 %v2351_v32, 16 }
  0x58   : > { %459 = vrot.lane.b32.xlu1 %v434_v51, %s2488_s6  ;;  %v443_v51 = vshll.u32 %v2332_v46, 16  ;;  %v1345_v53 = vsel %vm350_vm1, %v1340_v42, %v1344_v43  ;;  %v853_v34 = vrot.slane %v851_v29, 1  ;;  %v1347_v43 = vshrl.u32 %v2351_v32, 16  ;;  %v2352_v46 = vld [vmem:[%s2605_s28 + $0x74] ss:$0 sps:$4 sm:$0x11]  }
  0x59   : > { %451 = vrot.lane.b32.xlu0 %v386_v58, %s2488_s6  ;;  %v390_v58 = vshll.u32 %v2333_v52, 16  ;;  %v1297_v63 = vsel %vm350_vm1, %v1292_v49, %v1296_v50  ;;  %v1351_v48 = vrot.slane %v1349_v44, 1  ;;  %v2349_v49 = vld [vmem:[%s2605_s28 + $0x6c] sm:$0xff]   ;;  %v1354_v50 = vshll.u32 %v2352_v46, 16 }
  0x5a   : > { %v445_v56 = vrot.slane %v443_v51, 1  ;;  %v2354_v51 = vld [vmem:[%s2605_s28 + $0x44] ss:$0 sps:$4 sm:$0x11]  }
  0x5b   : > { %v392_v1 = vrot.slane %v390_v58, 1 }
  0x5c   : > { %605 = vrot.lane.b32.xlu1 %v589_v59, %s2487_s5  ;;  %v441_v59 = vor.u32 %v440_v54, %v436_v47  ;;  %v2353_v47 = vld [vmem:[%s2605_s28 + $0x3c] sm:$0xff]  }
  0x5d   : > { %597 = vrot.lane.b32.xlu0 %v577_v3, %s2487_s5  ;;  %v393_v6 = vor.u32 %v392_v1, %v388_v57  ;;  %v1301_v52 = vshll.u32 %v2353_v47, 16  ;;  %v1299_v54 = vshrl.u32 %v2353_v47, 16  ;;  %v1356_v57 = vrot.slane %v1354_v50, 1  ;;  %v2382_v47 = vld [vmem:[%s2605_s28 + $0x60] sm:$0xfe]  }
  0x5e   : > { %v446_v3 = vsel %vm350_vm1, %v441_v59, %v445_v56  ;;  %v1352_v56 = vor.u32 %v1351_v48, %v1347_v43  ;;  %v1306_v59 = vshll.u32 %v2354_v51, 16  ;;  %v1485_v43 = vrot.slane %v2380_v38, 1  ;;  %v2384_v51 = vld [vmem:[%s2605_s28 + $0x3c] sm:$0xfe]  }
  0x5f   : > { %v1303_v58 = vrot.slane %v1301_v52, 1  ;;  %v1497_v50 = vrot.slane %v2382_v47, 1 }
  0x60   : > { %698 = vrot.lane.b32.xlu1 %v2315_v4, %s2485_s29  ;;  %v397_v4 = vrot.slane %v395_v60, 1  ;;  %v2359_v60 = vld [vmem:[%s3059_s1 + $0x18] sm:$0xff]   ;;  %v1308_v2 = vrot.slane %v1306_v59, 1  ;;  %v2387_v59 = vld [vmem:[%s2605_s28 + $0x74] ss:$0 sps:$4 sm:$0x11]  }
  0x61   : > { %690 = vrot.lane.b32.xlu0 %v2316_v11, %s2485_s29  ;;  %v578_v11 = vrot.slane %v2337_v8, 1  ;;  %1645 = vmatpush1.bf16.msra.mxu0 %v2359_v60  ;;  %v1304_v1 = vor.u32 %v1303_v58, %v1299_v54  ;;  %v2368_v8 = vld [vmem:[%s2605_s28 + $0x18] sm:$0xfe]   ;;  %v1488_v54 = vrot.slane %v2384_v51, 1  ;;  %v2386_v58 = vld [vmem:[%s2605_s28 + $0x6c] sm:$0xfe]  }
  0x62   : > { %v398_v10 = vsel %vm350_vm1, %v393_v6, %v397_v4  ;;  %2171 = vmatpush1.bf16.msra.mxu1 %v2359_v60  ;;  %1646 = vmatprep.subr.bf16.mxu0 %v2484_v0  ;;  %v2365_v4 = vld [vmem:[%s2605_s28 + $0x3c] sm:$0xff]   ;;  %v2362_v6 = vld [vmem:[%s3059_s1 + $0x28] sm:$0xff]  }
  0x63   : > { %v580_v20 = vsel %vm568_vm0, %v578_v11, %v579_v12  ;;  %2163 = vmatprep.subr.bf16.mxu1 %v2484_v0  ;;  %259 = vst.msk [vmem:[#allocation2 + $0x50] sm:$0xff] %vm253_vm2, %v2365_v4  ;;  %v1309_v7 = vsel %vm350_vm1, %v1304_v1, %v1308_v2  ;;  %v2372_v11 = vld [vmem:[%s2605_s28 + $0x48] sm:$0xff]   ;;  %v1479_v12 = vrot.slane %v2368_v8, 1 }
  0x64   : > { %915 = vrot.lane.b32.xlu1 %v890_v18, %s2489_s7  ;;  %v2339_v18 = vld [vmem:[%s2605_s28 + $0x60] sm:$0xff]   ;;  %260 = vst.msk [vmem:[#allocation2 + $0x60] sm:$0xff] %vm253_vm2, %v2372_v11 }
  0x65   : > { %907 = vrot.lane.b32.xlu0 %v842_v25, %s2489_s7  ;;  %v897_v25 = vor.u32 %v896_v19, %v892_v14  ;;  %v2364_v19 = vld [vmem:[%s3059_s1 + $0x38] sm:$0xff]  }
  0x68   : > { %1060 = vrot.lane.b32.xlu1 %v1044_v28, %s2486_s4  ;;  %v848_v28 = vrot.slane %v846_v24, 1 }
  0x69   : > { %1052 = vrot.lane.b32.xlu0 %v1032_v36, %s2486_s4  ;;  %v902_v36 = vsel %vm350_vm1, %v897_v25, %v901_v27  ;;  %v2375_v25 = vld [vmem:[%s2605_s28 + $0x2c] ss:$0 sps:$4 sm:$0x11]  }
  0x6a   : > { %v849_v33 = vor.u32 %v848_v28, %v844_v23  ;;  %v2374_v23 = vld [vmem:[%s2605_s28 + $0x24] sm:$0xfe]   ;;  %v1483_v32 = vrot.slane %v2375_v25, 1 }
  0x6b   : > { %v1482_v27 = vrot.slane %v2374_v23, 1  ;;  %v2379_v28 = vld [vmem:[%s2605_s28 + $0x24] sm:$0xff]  }
  0x6c   : > { %1153 = vrot.lane.b32.xlu1 %v2325_v31, %s2490_s8  ;;  %v2346_v31 = vld [vmem:[%s2605_s28 + $0x68] ss:$0 sps:$4 sm:$0x11]   ;;  %v854_v42 = vsel %vm350_vm1, %v849_v33, %v853_v34  ;;  %v2376_v33 = vld [vmem:[%s2605_s28 + $0x54] sm:$0xfe]   ;;  %257 = vst.msk [vmem:[#allocation2 + $0x30] sm:$0xff] %vm253_vm2, %v2379_v28 }
  0x6d   : > { %1145 = vrot.lane.b32.xlu0 %v2326_v41, %s2490_s8  ;;  %v1046_v37 = vrot.slane %v2346_v31, 1  ;;  %v1034_v41 = vrot.slane %v2348_v39, 1  ;;  %v2367_v31 = vld [vmem:[%s3059_s1 + $0x40] sm:$0xff]   ;;  %v2377_v34 = vld [vmem:[%s2605_s28 + $0x5c] ss:$0 sps:$4 sm:$0x11]  }
  0x6f   : > { %v1047_v45 = vsel %vm568_vm0, %v1045_v35, %v1046_v37  ;;  %v1484_v35 = vsel %vm568_vm0, %v1482_v27, %v1483_v32  ;;  %v1495_v37 = vrot.slane %v2377_v34, 1 }
  0x70   : > { %1370 = vrot.lane.b32.xlu1 %v1345_v53, %s2491_s9  ;;  %v1035_v53 = vsel %vm568_vm0, %v1033_v40, %v1034_v41  ;;  %1512 = vst.msk [vmem:[#allocation2 + $0x18] sm:$0xff] %vm253_vm2, %v1484_v35 }
  0x71   : > { %1362 = vrot.lane.b32.xlu0 %v1297_v63, %s2491_s9  ;;  %v2361_v63 = vld [vmem:[%s3059_s1 + $0x20] sm:$0xff]  }
  0x72   : > { %1647 = vmatpush1.bf16.msra.mxu0 %v2361_v63  ;;  %2172 = vmatpush1.bf16.msra.mxu1 %v2361_v63  ;;  %v1501_v63 = vrot.slane %v2387_v59, 1 }
  0x73   : > { %1648 = vmatprep.subr.bf16.mxu0 %v2484_v0  ;;  %2164 = vmatprep.subr.bf16.mxu1 %v2484_v0 }
  0x74   : > { %461 = vrot.lane.b32.xlu1 %v446_v3, %s2488_s6  ;;  %v1357_v3 = vsel %vm350_vm1, %v1352_v56, %v1356_v57 }
  0x75   : > { %453 = vrot.lane.b32.xlu0 %v398_v10, %s2488_s6  ;;  %v2369_v10 = vld [vmem:[%s2605_s28 + $0x20] ss:$0 sps:$4 sm:$0x11]  }
  0x76   : > { %1649 = vmatpush1.bf16.msra.mxu0 %v2362_v6  ;;  %v1480_v16 = vrot.slane %v2369_v10, 1  ;;  %2173 = vmatpush1.bf16.msra.mxu1 %v2362_v6 }
  0x77   : > { %1650 = vmatprep.subr.bf16.mxu0 %v2484_v0  ;;  %2165 = vmatprep.subr.bf16.mxu1 %v2484_v0 }
  0x78   : > { %607 = vrot.lane.b32.xlu1 %v592_v13, %s2487_s5  ;;  %v2373_v13 = vld [vmem:[%s2605_s28 + $0x18] sm:$0xff]  }
  0x79   : > { %599 = vrot.lane.b32.xlu0 %v580_v20, %s2487_s5  ;;  %256 = vst.msk [vmem:[#allocation2 + $0x20] sm:$0xff] %vm253_vm2, %v2373_v13  ;;  %v1481_v20 = vsel %vm568_vm0, %v1479_v12, %v1480_v16  ;;  %v1522_v12 = vld [vmem:[#allocation2 + $0x18] sm:$0xff]  ;;  %s2998_s5 = scalar_lea.hbm %s3061_s3, %s2154_s15 }
  0x7a   : > { %1511 = vst.msk [vmem:[#allocation2 + $0x8] sm:$0xff] %vm253_vm2, %v1481_v20  ;;  %1651 = vmatpush1.bf16.msra.mxu0 %v2363_v9  ;;  %2174 = vmatpush1.bf16.msra.mxu1 %v2363_v9 }
  0x7b   : > { %1652 = vmatprep.subr.bf16.mxu0 %v2484_v0  ;;  %2166 = vmatprep.subr.bf16.mxu1 %v2484_v0 }
  0x7c   : > { %700 = vrot.lane.b32.xlu1 %v2339_v18, %s2485_s29  ;;  %v2371_v18 = vld [vmem:[%s2605_s28 + $0x50] ss:$0 sps:$4 sm:$0x11]  }
  0x7d   : > { %692 = vrot.lane.b32.xlu0 %v2340_v26, %s2485_s29  ;;  %v1492_v22 = vrot.slane %v2371_v18, 1  ;;  %v2378_v26 = vld [vmem:[%s2605_s28 + $0x54] sm:$0xff]  }
  0x7e   : > { %261 = vst.msk [vmem:[#allocation2 + $0x70] sm:$0xff] %vm253_vm2, %v2378_v26  ;;  %1653 = vmatpush1.bf16.msra.mxu0 %v2364_v19  ;;  %2175 = vmatpush1.bf16.msra.mxu1 %v2364_v19 }
  0x7f   : > { %v1493_v24 = vsel %vm568_vm0, %v1491_v21, %v1492_v22  ;;  %1654 = vmatprep.subr.bf16.mxu0 %v2484_v0  ;;  %2167 = vmatprep.subr.bf16.mxu1 %v2484_v0  ;;  %v2383_v0 = vld [vmem:[%s2605_s28 + $0x68] ss:$0 sps:$4 sm:$0x11]  }
  0x80   : > { %917 = vrot.lane.b32.xlu1 %v902_v36, %s2489_s7  ;;  %1515 = vst.msk [vmem:[#allocation2 + $0x48] sm:$0xff] %vm253_vm2, %v1493_v24  ;;  %v1494_v36 = vrot.slane %v2376_v33, 1  ;;  %v1498_v52 = vrot.slane %v2383_v0, 1 }
  0x81   : > { %909 = vrot.lane.b32.xlu0 %v854_v42, %s2489_s7  ;;  %v1520_v40 = vld [vmem:[#allocation2 + $0x8] sm:$0xff] }
  0x82   : > { %v1496_v41 = vsel %vm568_vm0, %v1494_v36, %v1495_v37  ;;  %v2381_v42 = vld [vmem:[%s2605_s28 + $0x38] ss:$0 sps:$4 sm:$0x11]   ;;  %2142 = vmatprep.mubr.msk.bf16.mxu0 %vm253_vm2, %v1520_v40  ;;  %1655 = vmatpush1.bf16.msra.mxu0 %v2367_v31  ;;  %v1499_v56 = vsel %vm568_vm0, %v1497_v50, %v1498_v52 }
  0x83   : > { %1516 = vst.msk [vmem:[#allocation2 + $0x58] sm:$0xff] %vm253_vm2, %v1496_v41  ;;  %v1486_v46 = vrot.slane %v2381_v42, 1  ;;  %2176 = vmatpush1.bf16.msra.mxu1 %v2367_v31  ;;  %1517 = vst.msk [vmem:[#allocation2 + $0x68] sm:$0xff] %vm253_vm2, %v1499_v56 }
  0x84   : > { %1062 = vrot.lane.b32.xlu1 %v1047_v45, %s2486_s4 }
  0x85   : > { %1054 = vrot.lane.b32.xlu0 %v1035_v53, %s2486_s4  ;;  %v2385_v53 = vld [vmem:[%s2605_s28 + $0x44] ss:$0 sps:$4 sm:$0x11]   ;;  %s175_s28 = sand.u32 1, %s2458_s13  }
  0x86   : > { %v1489_v57 = vrot.slane %v2385_v53, 1  ;;  %s1875_s11 = sshll.u32 %s175_s28, 7  ;;  %s3006_s6 = scalar_lea.sflag [#allocation4], %s175_s28 }
  0x87   : > { %v1528_v45 = vld [vmem:[#allocation2 + $0x48] sm:$0xff]  ;;  %s2963_s20 = scalar_lea.vmem [#allocation3], %s1875_s11 }
  0x88   : > { %1155 = vrot.lane.b32.xlu1 %v2349_v49, %s2490_s8  ;;  %2146 = vmatprep.mubr.msk.bf16.mxu1 %vm253_vm2, %v1528_v45  ;;  %v1487_v49 = vsel %vm568_vm0, %v1485_v43, %v1486_v46  ;;  %v1490_v61 = vsel %vm568_vm0, %v1488_v54, %v1489_v57  ;;  %s1784_s16 = sshll.u32 %s2963_s20, 4  ;;  %s3000_s16 = int_to_ptr.vmem [resolvable:$true] %s1784_s16 }
  0x89   : > { %1147 = vrot.lane.b32.xlu0 %v2350_v62, %s2490_s8  ;;  %1513 = vst.msk [vmem:[#allocation2 + $0x28] sm:$0xff] %vm253_vm2, %v1487_v49  ;;  %v1500_v62 = vrot.slane %v2386_v58, 1  ;;  %1514 = vst.msk [vmem:[#allocation2 + $0x38] sm:$0xff] %vm253_vm2, %v1490_v61  ;;  %s2388_s7 = scalar_lea.vmem %s3000_s16, 2048  ;;  %s2492_s8 = smov [#allocation3]  }
  0x8a   : > { %v1530_v9 = vld [vmem:[#allocation2 + $0x58] sm:$0xff]  ;;  %v1532_v27 = vld [vmem:[#allocation2 + $0x68] sm:$0xff]  ;;  %p2389_p13 = scmp.ne.s32.totalorder %s3000_s16, %s2388_s7 }
  0x8b   : > { %v1502_v2 = vsel %vm568_vm0, %v1500_v62, %v1501_v63  ;;  %v2956_v62 = vld [vmem:[%s3060_s2] ss:$0 sm:$0xff] }
  0x8c   : > { %1372 = vrot.lane.b32.xlu1 %v1357_v3, %s2491_s9  ;;  %1518 = vst.msk [vmem:[#allocation2 + $0x78] sm:$0xff] %vm253_vm2, %v1502_v2  ;;  %p2390_p0 = pnand %p2389_p13, %p2566_p3 }
  0x8d   : > { %1364 = vrot.lane.b32.xlu0 %v1309_v7, %s2491_s9  ;;  %s2392_s9 = sshll.u32 %s2492_s8, 4  ;;  %s2393_s9 = int_to_ptr.vmem [resolvable:$false] %s2392_s9 }
  0x8e   : > { %p2391_p1 = pneg %p2390_p0  ;;  %s2394_s10 = scalar_lea.vmem %s2393_s9, 4096 }
  0x8f   : > { %p2395_p2 = scmp.lt.s32.totalorder %s3000_s16, %s2393_s9  ;;  %p2396_p4 = scmp.lt.s32.totalorder %s2394_s10, %s2388_s7 }
  0x90   : > { %v1526_v0 = vld [vmem:[#allocation2 + $0x38] sm:$0xff] }
  0x91   : > { %v2831_v14 = vpop.permute.xlu1 %694  ;;  %v2833_v15 = vpop.permute.xlu0 %686  ;;  %p2397_p5 = por %p2396_p4, %p2395_p2 }
  0x93   : > { %v1534_v45 = vld [vmem:[#allocation2 + $0x78] sm:$0xff]  ;;  %p2398_p6 = pnand %p2397_p5, %p2391_p1 }
  0x95   : > { %v2853_v29 = vpop.permute.xlu0 %1048 }
  0x96   : > { %v594_v30 = vpop.permute.xlu1 %593 }
  0x9a   : > { %v602_v39 = vpop.permute.xlu1 %601 }
  0x9b   : > { %v448_v44 = vpop.permute.xlu0 %447 }
  0x9c   : > { %472 = vst.msk [vmem:[#allocation2] sm:$0xff] %vm471_vm3, %v448_v44 }
  0x9d   : > { %618 = vst.msk [vmem:[#allocation2] sm:$0xff] %vm617_vm4, %v594_v30  ;;  %v1524_v30 = vld [vmem:[#allocation2 + $0x28] sm:$0xff] }
  0x9e   : > { %v1057_v48 = vpop.permute.xlu1 %1056  ;;  %711 = vst.msk [vmem:[#allocation2] sm:$0xff] %vm710_vm5, %v2833_v15 }
  0x9f   : > { %v456_v55 = vpop.permute.xlu0 %455 }
  0xa0   : > { %476 = vst.msk [vmem:[#allocation2 + $0x40] sm:$0xff] %vm471_vm3, %v456_v55 }
  0xa1   : > { %622 = vst.msk [vmem:[#allocation2 + $0x40] sm:$0xff] %vm617_vm4, %v602_v39 }
  0xa2   : > { %v912_v60 = vpop.permute.xlu1 %911  ;;  %715 = vst.msk [vmem:[#allocation2 + $0x40] sm:$0xff] %vm710_vm5, %v2831_v14 }
  0xa3   : > { %932 = vst.msk [vmem:[#allocation2 + $0x40] sm:$0xff] %vm927_vm6, %v912_v60  ;;  %v904_v1 = vpop.permute.xlu0 %903 }
  0xa4   : > { %928 = vst.msk [vmem:[#allocation2] sm:$0xff] %vm927_vm6, %v904_v1 }
  0xa5   : > { %1077 = vst.msk [vmem:[#allocation2 + $0x40] sm:$0xff] %vm1072_vm7, %v1057_v48  ;;  %1073 = vst.msk [vmem:[#allocation2] sm:$0xff] %vm1072_vm7, %v2853_v29 }
  0xa6   : > { %v1150_v3 = vpop.permute.xlu1 %1149 }
  0xa7   : > { %1170 = vst.msk [vmem:[#allocation2 + $0x40] sm:$0xff] %vm1165_vm8, %v1150_v3  ;;  %v1142_v4 = vpop.permute.xlu0 %1141 }
  0xa8   : > { %1166 = vst.msk [vmem:[#allocation2] sm:$0xff] %vm1165_vm8, %v1142_v4 }
  0xaa   : > { %v1367_v5 = vpop.permute.xlu1 %1366 }
  0xab   : > { %1387 = vst.msk [vmem:[#allocation2 + $0x40] sm:$0xff] %vm1382_vm9, %v1367_v5  ;;  %v1359_v6 = vpop.permute.xlu0 %1358 }
  0xac   : > { %1383 = vst.msk [vmem:[#allocation2] sm:$0xff] %vm1382_vm9, %v1359_v6 }
  0xae   : > { %v458_v7 = vpop.permute.xlu1 %457 }
  0xaf   : > { %477 = vst.msk [vmem:[#allocation2 + $0x50] sm:$0xff] %vm471_vm3, %v458_v7  ;;  %v450_v8 = vpop.permute.xlu0 %449 }
  0xb0   : > { %473 = vst.msk [vmem:[#allocation2 + $0x10] sm:$0xff] %vm471_vm3, %v450_v8 }
  0xb2   : > { %v604_v10 = vpop.permute.xlu1 %603  ;;  %v1527_v11 = vld [vmem:[#allocation2 + $0x40] sm:$0xff] }
  0xb3   : > { %623 = vst.msk [vmem:[#allocation2 + $0x50] sm:$0xff] %vm617_vm4, %v604_v10  ;;  %1703 = vmatmul.mubr.bf16.vlgmr.msra.gmra.mrb[0].mxu1 %v1527_v11  ;;  %v1519_v13 = vld [vmem:[#allocation2] sm:$0xff]  ;;  %v596_v14 = vpop.permute.xlu0 %595 }
  0xb4   : > { %2147 = vmatprep.mubr.msk.bf16.mxu1 %vm253_vm2, %v1530_v9  ;;  %1671 = vmatmul.mubr.bf16.vlgmr.msra.gmra.mrb[0].mxu0 %v1519_v13  ;;  %619 = vst.msk [vmem:[#allocation2 + $0x10] sm:$0xff] %vm617_vm4, %v596_v14 }
  0xb5   : > { %2143 = vmatprep.mubr.msk.bf16.mxu0 %vm253_vm2, %v1522_v12 }
  0xb6   : > { %v697_v15 = vpop.permute.xlu1 %696 }
  0xb7   : > { %716 = vst.msk [vmem:[#allocation2 + $0x50] sm:$0xff] %vm710_vm5, %v697_v15  ;;  %v689_v16 = vpop.permute.xlu0 %688 }
  0xb8   : > { %712 = vst.msk [vmem:[#allocation2 + $0x10] sm:$0xff] %vm710_vm5, %v689_v16 }
  0xba   : > { %v914_v17 = vpop.permute.xlu1 %913 }
  0xbb   : > { %933 = vst.msk [vmem:[#allocation2 + $0x50] sm:$0xff] %vm927_vm6, %v914_v17  ;;  %v906_v18 = vpop.permute.xlu0 %905 }
  0xbc   : > { %929 = vst.msk [vmem:[#allocation2 + $0x10] sm:$0xff] %vm927_vm6, %v906_v18 }
  0xbe   : > { %v1059_v19 = vpop.permute.xlu1 %1058 }
  0xbf   : > { %1078 = vst.msk [vmem:[#allocation2 + $0x50] sm:$0xff] %vm1072_vm7, %v1059_v19  ;;  %v1051_v20 = vpop.permute.xlu0 %1050 }
  0xc0   : > { %1074 = vst.msk [vmem:[#allocation2 + $0x10] sm:$0xff] %vm1072_vm7, %v1051_v20 }
  0xc2   : > { %v1152_v21 = vpop.permute.xlu1 %1151 }
  0xc3   : > { %1171 = vst.msk [vmem:[#allocation2 + $0x50] sm:$0xff] %vm1165_vm8, %v1152_v21  ;;  %v1144_v22 = vpop.permute.xlu0 %1143 }
  0xc4   : > { %1167 = vst.msk [vmem:[#allocation2 + $0x10] sm:$0xff] %vm1165_vm8, %v1144_v22 }
  0xc6   : > { %v1369_v23 = vpop.permute.xlu1 %1368 }
  0xc7   : > { %1388 = vst.msk [vmem:[#allocation2 + $0x50] sm:$0xff] %vm1382_vm9, %v1369_v23  ;;  %v1361_v24 = vpop.permute.xlu0 %1360 }
  0xc8   : > { %1384 = vst.msk [vmem:[#allocation2 + $0x10] sm:$0xff] %vm1382_vm9, %v1361_v24 }
  0xca   : > { %v460_v25 = vpop.permute.xlu1 %459 }
  0xcb   : > { %478 = vst.msk [vmem:[#allocation2 + $0x60] sm:$0xff] %vm471_vm3, %v460_v25  ;;  %v452_v26 = vpop.permute.xlu0 %451 }
  0xcc   : > { %474 = vst.msk [vmem:[#allocation2 + $0x20] sm:$0xff] %vm471_vm3, %v452_v26 }
  0xce   : > { %v606_v28 = vpop.permute.xlu1 %605  ;;  %v1529_v29 = vld [vmem:[#allocation2 + $0x50] sm:$0xff] }
  0xcf   : > { %624 = vst.msk [vmem:[#allocation2 + $0x60] sm:$0xff] %vm617_vm4, %v606_v28  ;;  %1711 = vmatmul.mubr.bf16.gmra.mrb[4].mxu1 %v1529_v29  ;;  %v598_v31 = vpop.permute.xlu0 %597  ;;  %v1521_v32 = vld [vmem:[#allocation2 + $0x10] sm:$0xff] }
  0xd0   : > { %2148 = vmatprep.mubr.msk.bf16.mxu1 %vm253_vm2, %v1532_v27  ;;  %620 = vst.msk [vmem:[#allocation2 + $0x20] sm:$0xff] %vm617_vm4, %v598_v31  ;;  %1679 = vmatmul.mubr.bf16.gmra.mrb[4].mxu0 %v1521_v32 }
  0xd1   : > { %2144 = vmatprep.mubr.msk.bf16.mxu0 %vm253_vm2, %v1524_v30 }
  0xd2   : > { %v699_v33 = vpop.permute.xlu1 %698 }
  0xd3   : > { %717 = vst.msk [vmem:[#allocation2 + $0x60] sm:$0xff] %vm710_vm5, %v699_v33  ;;  %v691_v34 = vpop.permute.xlu0 %690 }
  0xd4   : > { %713 = vst.msk [vmem:[#allocation2 + $0x20] sm:$0xff] %vm710_vm5, %v691_v34 }
  0xd6   : > { %v916_v35 = vpop.permute.xlu1 %915 }
  0xd7   : > { %934 = vst.msk [vmem:[#allocation2 + $0x60] sm:$0xff] %vm927_vm6, %v916_v35  ;;  %v908_v36 = vpop.permute.xlu0 %907 }
  0xd8   : > { %930 = vst.msk [vmem:[#allocation2 + $0x20] sm:$0xff] %vm927_vm6, %v908_v36 }
  0xda   : > { %v1061_v37 = vpop.permute.xlu1 %1060 }
  0xdb   : > { %1079 = vst.msk [vmem:[#allocation2 + $0x60] sm:$0xff] %vm1072_vm7, %v1061_v37  ;;  %v1053_v38 = vpop.permute.xlu0 %1052 }
  0xdc   : > { %1075 = vst.msk [vmem:[#allocation2 + $0x20] sm:$0xff] %vm1072_vm7, %v1053_v38 }
  0xde   : > { %v1154_v39 = vpop.permute.xlu1 %1153 }
  0xdf   : > { %1172 = vst.msk [vmem:[#allocation2 + $0x60] sm:$0xff] %vm1165_vm8, %v1154_v39  ;;  %v1146_v40 = vpop.permute.xlu0 %1145 }
  0xe0   : > { %1168 = vst.msk [vmem:[#allocation2 + $0x20] sm:$0xff] %vm1165_vm8, %v1146_v40 }
  0xe2   : > { %v1371_v41 = vpop.permute.xlu1 %1370 }
  0xe3   : > { %1389 = vst.msk [vmem:[#allocation2 + $0x60] sm:$0xff] %vm1382_vm9, %v1371_v41  ;;  %v1363_v42 = vpop.permute.xlu0 %1362 }
  0xe4   : > { %1385 = vst.msk [vmem:[#allocation2 + $0x20] sm:$0xff] %vm1382_vm9, %v1363_v42 }
  0xe6   : > { %v462_v43 = vpop.permute.xlu1 %461 }
  0xe7   : > { %479 = vst.msk [vmem:[#allocation2 + $0x70] sm:$0xff] %vm471_vm3, %v462_v43  ;;  %v454_v44 = vpop.permute.xlu0 %453 }
  0xe8   : > { %475 = vst.msk [vmem:[#allocation2 + $0x30] sm:$0xff] %vm471_vm3, %v454_v44 }
  0xea   : > { %v608_v46 = vpop.permute.xlu1 %607  ;;  %v1531_v47 = vld [vmem:[#allocation2 + $0x60] sm:$0xff] }
  0xeb   : > { %625 = vst.msk [vmem:[#allocation2 + $0x70] sm:$0xff] %vm617_vm4, %v608_v46  ;;  %1719 = vmatmul.mubr.bf16.gmra.mrb[8].mxu1 %v1531_v47  ;;  %v600_v48 = vpop.permute.xlu0 %599  ;;  %v1523_v49 = vld [vmem:[#allocation2 + $0x20] sm:$0xff] }
  0xec   : > { %2149 = vmatprep.mubr.msk.bf16.mxu1 %vm253_vm2, %v1534_v45  ;;  %621 = vst.msk [vmem:[#allocation2 + $0x30] sm:$0xff] %vm617_vm4, %v600_v48  ;;  %1687 = vmatmul.mubr.bf16.gmra.mrb[8].mxu0 %v1523_v49 }
  0xed   : > { %2145 = vmatprep.mubr.msk.bf16.mxu0 %vm253_vm2, %v1526_v0 }
  0xee   : > { %v701_v50 = vpop.permute.xlu1 %700 }
  0xef   : > { %718 = vst.msk [vmem:[#allocation2 + $0x70] sm:$0xff] %vm710_vm5, %v701_v50  ;;  %v693_v51 = vpop.permute.xlu0 %692 }
  0xf0   : > { %714 = vst.msk [vmem:[#allocation2 + $0x30] sm:$0xff] %vm710_vm5, %v693_v51 }
  0xf2   : > { %v918_v52 = vpop.permute.xlu1 %917 }
  0xf3   : > { %935 = vst.msk [vmem:[#allocation2 + $0x70] sm:$0xff] %vm927_vm6, %v918_v52  ;;  %v910_v53 = vpop.permute.xlu0 %909 }
  0xf4   : > { %931 = vst.msk [vmem:[#allocation2 + $0x30] sm:$0xff] %vm927_vm6, %v910_v53 }
  0xf6   : > { %v1063_v54 = vpop.permute.xlu1 %1062 }
  0xf7   : > { %1080 = vst.msk [vmem:[#allocation2 + $0x70] sm:$0xff] %vm1072_vm7, %v1063_v54  ;;  %v1055_v55 = vpop.permute.xlu0 %1054 }
  0xf8   : > { %1076 = vst.msk [vmem:[#allocation2 + $0x30] sm:$0xff] %vm1072_vm7, %v1055_v55 }
  0xfa   : > { %v1156_v56 = vpop.permute.xlu1 %1155 }
  0xfb   : > { %1173 = vst.msk [vmem:[#allocation2 + $0x70] sm:$0xff] %vm1165_vm8, %v1156_v56  ;;  %v1148_v57 = vpop.permute.xlu0 %1147 }
  0xfc   : > { %1169 = vst.msk [vmem:[#allocation2 + $0x30] sm:$0xff] %vm1165_vm8, %v1148_v57 }
  0xfe   : > { %v1373_v58 = vpop.permute.xlu1 %1372 }
  0xff   : > { %1390 = vst.msk [vmem:[#allocation2 + $0x70] sm:$0xff] %vm1382_vm9, %v1373_v58  ;;  %v1365_v59 = vpop.permute.xlu0 %1364 }
 0x100   : > { %1386 = vst.msk [vmem:[#allocation2 + $0x30] sm:$0xff] %vm1382_vm9, %v1365_v59 }
 0x106   : > { %v1533_v60 = vld [vmem:[#allocation2 + $0x70] sm:$0xff] }
 0x107   : > { %1727 = vmatmul.mubr.bf16.gmra.mrb[12].mxu1 %v1533_v60  ;;  %v1525_v61 = vld [vmem:[#allocation2 + $0x30] sm:$0xff] }
 0x108   : > { %1695 = vmatmul.mubr.bf16.gmra.mrb[12].mxu0 %v1525_v61 }
 0x186   : > { %v1704_v63 = vpop.f32.mrb[0].mxu1 }
 0x187   : > { %v1705_v1 = vadd.f32 %v2956_v62, %v1704_v63  ;;  %v1706_v2 = vpop.f32.mrb[1].mxu1  ;;  %v1672_v3 = vpop.f32.mrb[0].mxu0 }
 0x188   : > { %v1707_v4 = vpop.f32.mrb[2].mxu1  ;;  %v1673_v5 = vadd.f32 %v2956_v62, %v1672_v3  ;;  %v1674_v7 = vpop.f32.mrb[1].mxu0 }
 0x189   : > { %v1743_v6 = vmax.f32 %v1705_v1, 0.0  ;;  %v1708_v8 = vadd.f32 %v2956_v62, %v1707_v4  ;;  %v1709_v9 = vpop.f32.mrb[3].mxu1  ;;  %v1675_v10 = vpop.f32.mrb[2].mxu0 }
 0x18a   : > { %v1735_v11 = vmax.f32 %v1673_v5, 0.0  ;;  %v1676_v12 = vadd.f32 %v2956_v62, %v1675_v10  ;;  %v1677_v14 = vpop.f32.mrb[3].mxu0 }
 0x18b   : > { %1759 = vst [vmem:[%s2963_s20 + $0x40] sm:$0xff] %v1743_v6  ;;  %v1744_v13 = vmax.f32 %v1708_v8, 0.0 }
 0x18c   : > { %1751 = vst [vmem:[%s2963_s20] sm:$0xff] %v1735_v11  ;;  %v1736_v15 = vmax.f32 %v1676_v12, 0.0 }
 0x18d   : > { %1760 = vst [vmem:[%s2963_s20 + $0x48] sm:$0xff] %v1744_v13 }
 0x18e   : > { %1752 = vst [vmem:[%s2963_s20 + $0x8] sm:$0xff] %v1736_v15 }
 0x1a2   : > { %v1712_v16 = vpop.f32.mrb[4].mxu1 }
 0x1a3   : > { %v1713_v17 = vadd.f32 %v2956_v62, %v1712_v16  ;;  %v1714_v18 = vpop.f32.mrb[5].mxu1  ;;  %v1680_v20 = vpop.f32.mrb[4].mxu0 }
 0x1a4   : > { %v1715_v19 = vpop.f32.mrb[6].mxu1  ;;  %v1681_v24 = vadd.f32 %v2956_v62, %v1680_v20  ;;  %v1682_v25 = vpop.f32.mrb[5].mxu0 }
 0x1a5   : > { %v1745_v21 = vmax.f32 %v1713_v17, 0.0  ;;  %v1716_v22 = vadd.f32 %v2956_v62, %v1715_v19  ;;  %v1717_v23 = vpop.f32.mrb[7].mxu1  ;;  %v1683_v26 = vpop.f32.mrb[6].mxu0 }
 0x1a6   : > { %v1737_v28 = vmax.f32 %v1681_v24, 0.0  ;;  %v1684_v29 = vadd.f32 %v2956_v62, %v1683_v26  ;;  %v1685_v30 = vpop.f32.mrb[7].mxu0 }
 0x1a7   : > { %1761 = vst [vmem:[%s2963_s20 + $0x50] sm:$0xff] %v1745_v21  ;;  %v1746_v27 = vmax.f32 %v1716_v22, 0.0 }
 0x1a8   : > { %1753 = vst [vmem:[%s2963_s20 + $0x10] sm:$0xff] %v1737_v28  ;;  %v1738_v31 = vmax.f32 %v1684_v29, 0.0 }
 0x1a9   : > { %1762 = vst [vmem:[%s2963_s20 + $0x58] sm:$0xff] %v1746_v27 }
 0x1aa   : > { %1754 = vst [vmem:[%s2963_s20 + $0x18] sm:$0xff] %v1738_v31 }
 0x1be   : > { %v1720_v32 = vpop.f32.mrb[8].mxu1 }
 0x1bf   : > { %v1721_v33 = vadd.f32 %v2956_v62, %v1720_v32  ;;  %v1722_v34 = vpop.f32.mrb[9].mxu1  ;;  %v1688_v36 = vpop.f32.mrb[8].mxu0 }
 0x1c0   : > { %v1723_v35 = vpop.f32.mrb[10].mxu1  ;;  %v1689_v40 = vadd.f32 %v2956_v62, %v1688_v36  ;;  %v1690_v41 = vpop.f32.mrb[9].mxu0 }
 0x1c1   : > { %v1747_v37 = vmax.f32 %v1721_v33, 0.0  ;;  %v1724_v38 = vadd.f32 %v2956_v62, %v1723_v35  ;;  %v1725_v39 = vpop.f32.mrb[11].mxu1  ;;  %v1691_v42 = vpop.f32.mrb[10].mxu0 }
 0x1c2   : > { %v1739_v44 = vmax.f32 %v1689_v40, 0.0  ;;  %v1692_v45 = vadd.f32 %v2956_v62, %v1691_v42  ;;  %v1693_v46 = vpop.f32.mrb[11].mxu0 }
 0x1c3   : > { %1763 = vst [vmem:[%s2963_s20 + $0x60] sm:$0xff] %v1747_v37  ;;  %v1748_v43 = vmax.f32 %v1724_v38, 0.0 }
 0x1c4   : > { %1755 = vst [vmem:[%s2963_s20 + $0x20] sm:$0xff] %v1739_v44  ;;  %v1740_v47 = vmax.f32 %v1692_v45, 0.0 }
 0x1c5   : > { %1764 = vst [vmem:[%s2963_s20 + $0x68] sm:$0xff] %v1748_v43 }
 0x1c6   : > { %1756 = vst [vmem:[%s2963_s20 + $0x28] sm:$0xff] %v1740_v47 }
 0x1da   : > { %v1728_v0 = vpop.f32.mrb[12].mxu1 }
 0x1db   : > { %v1729_v48 = vadd.f32 %v2956_v62, %v1728_v0  ;;  %v1730_v49 = vpop.f32.mrb[13].mxu1  ;;  %v1696_v51 = vpop.f32.mrb[12].mxu0 }
 0x1dc   : > { %v1731_v50 = vpop.f32.mrb[14].mxu1  ;;  %v1697_v55 = vadd.f32 %v2956_v62, %v1696_v51  ;;  %v1698_v56 = vpop.f32.mrb[13].mxu0 }
 0x1dd   : > { %v1749_v52 = vmax.f32 %v1729_v48, 0.0  ;;  %v1732_v53 = vadd.f32 %v2956_v62, %v1731_v50  ;;  %v1733_v54 = vpop.f32.mrb[15].mxu1  ;;  %v1699_v57 = vpop.f32.mrb[14].mxu0 }
 0x1de   : > { %v1741_v59 = vmax.f32 %v1697_v55, 0.0  ;;  %v1700_v60 = vadd.f32 %v2956_v62, %v1699_v57  ;;  %v1701_v61 = vpop.f32.mrb[15].mxu0 }
 0x1df   : > { %1765 = vst [vmem:[%s2963_s20 + $0x70] sm:$0xff] %v1749_v52  ;;  %v1750_v58 = vmax.f32 %v1732_v53, 0.0 }
 0x1e0   : > { %1757 = vst [vmem:[%s2963_s20 + $0x30] sm:$0xff] %v1741_v59  ;;  %v1742_v63 = vmax.f32 %v1700_v60, 0.0 }
 0x1e1   : > { %1766 = vst [vmem:[%s2963_s20 + $0x78] sm:$0xff] %v1750_v58 }
 0x1e2   : > { %1758 = vst [vmem:[%s2963_s20 + $0x38] sm:$0xff] %v1742_v63 }
 0x1e3   : > { %2401 = shalt.err (!%p2398_p6)
}
 0x1e4   : > { %s2402_s28 = scalar_lea.hbm %s2998_s5, 2048  ;;  %s2406_s21 = scalar_lea.hbm %s3061_s3, 8192 }
 0x1e5   : > { %p2403_p7 = scmp.ne.s32.totalorder %s2998_s5, %s2402_s28  ;;  %p2407_p11 = scmp.lt.u32.totalorder %s2998_s5, %s3061_s3 }
 0x1e6   : > { %p2408_p12 = scmp.lt.u32.totalorder %s2406_s21, %s2402_s28  ;;  %p2410_p0 = scmp.lt.u32.totalorder %s2402_s28, %s2998_s5 }
 0x1e7   : > { %p2404_p9 = pnand %p2403_p7, %p2566_p3 }
 0x1e8   : > { %p2409_p13 = por %p2408_p12, %p2407_p11 }
 0x1e9   : > { %p2405_p10 = pneg %p2404_p9 }
 0x1ea   : > { %p2411_p1 = por %p2410_p0, %p2409_p13 }
 0x1ec   : > { %p2412_p2 = pnand %p2411_p1, %p2405_p10 }
 0x1ee   : > { %2415 = shalt.err (!%p2412_p2)
}
 0x1ef   : > { %s2493_s15 = smov 128   ;;  %s2494_s29 = smov 8  }
 0x1f0   : > { %2178 = dma.vmem_to_hbm [thread:$0]  (%p2566_p3), %s3000_s16, 2048, %s2998_s5, %s3006_s6, %s2493_s15, %s2493_s15, %s2494_s29  }
 0x1f1 PF: > { %p2184_p4 = scmp.ge.s32.totalorder %s2482_s19, 2  ;;  %s1799_s4 = sand.u32 1, %s2454_s12  }
 0x1f2   : > { %s1800_s7 = scalar_lea.sflag [#allocation4], %s1799_s4 }
 0x1f3   : > { %p2181_p5 = pnand %p2184_p4, %p2575_p8 }
 0x1f5   : > { %2449 = dma.done.wait (!%p2181_p5), %s1800_s7, 2048  }
 0x1f6   : > { %2451 = vsyncadd (!%p2181_p5), %s1800_s7, 4294965248  ;;  %s16_s19 = sadd.s32 1, %s2482_s19   ;;  %s3064_s12 = smov %s2458_s13 }
 0x1f7   : > { %p13_p6 = scmp.ge.s32.totalorder %s16_s19, 6   ;;  %s3065_s13 = smov %s2462_s14 }
 0x1f8   : > { %s3066_s14 = smov %s2584_s30  ;;  %s3067_s15 = smov %s2474_s17 }
 0x1f9   : > { %s3068_s16 = smov %s2478_s18  ;;  %s3069_s17 = smov %s3072_s22 }
 0x1fa   : > { %s3070_s18 = smov %s3076_s23  ;;  %15 = sbr.rel (!%p13_p6) target bundleno = 5 (0x5), region = 70 }
 0x201   :  { %1805 = vsyncpa [#allocation4], 1 }
 0x202   :  { %1807 = vsyncpa [#allocation4 + $0x1], 1 }

</bundles_post_ra>
